<compile_context>
chip_gen: v7x
topology: tpu7x:2x2x1
jax: 0.10.0
libtpu: 0.0.40
codegen_flags: <defaults>
</compile_context>

<pallas_src>
import math
import functools

import jax
import jax.numpy as jnp
from jax.experimental import pallas as pl
from jax.experimental.pallas import tpu as pltpu


def _mhsa_kernel(q_ref, k_ref, v_ref,
                 wq_ref, wk_ref, wv_ref, wo_ref,
                 bq_ref, bk_ref, bv_ref, bo_ref,
                 o_ref, *, num_heads, head_dim, scale):
    # q_ref/k_ref/v_ref/o_ref: (B_blk, S, D)   model_dim on lanes
    # w*_ref:                  (D, D) bf16, already transposed -> y = x @ w + b
    # b*_ref:                  (1, D) f32
    B, S, D = q_ref.shape
    M = B * S
    H, hd = num_heads, head_dim

    def proj(x_ref, w_ref, b_ref):
        # (B*S, D) @ (D, D): bf16 MXU operands, f32 accumulation, f32 bias add.
        x = x_ref[...].reshape(M, D).astype(jnp.bfloat16)
        return jnp.dot(x, w_ref[...], preferred_element_type=jnp.float32) + b_ref[...]

    Q = proj(q_ref, wq_ref, bq_ref) * scale      # fold 1/sqrt(hd) into Q (f32)
    K = proj(k_ref, wk_ref, bk_ref)
    V = proj(v_ref, wv_ref, bv_ref)

    # Per-head attention: short static head loop; within a head the whole batch
    # block is handled by one batched einsum, so the 4-lane head slices happen
    # once per head per grid step (not per batch element).
    ctx_heads = []
    for h in range(H):
        sl = slice(h * hd, (h + 1) * hd)
        qh = Q[:, sl].astype(jnp.bfloat16).reshape(B, S, hd)
        kh = K[:, sl].astype(jnp.bfloat16).reshape(B, S, hd)
        vh = V[:, sl].astype(jnp.bfloat16).reshape(B, S, hd)

        # scores = qh @ kh^T (contract head_dim), f32 accumulation.
        s = jnp.einsum('bqd,bkd->bqk', qh, kh,
                       preferred_element_type=jnp.float32)        # (B, S, S)
        # numerically-stable softmax over keys, kept in f32
        s = s - jnp.max(s, axis=-1, keepdims=True)
        p = jnp.exp(s)
        p = p * pl.reciprocal(jnp.sum(p, axis=-1, keepdims=True), approx=True)

        ctx = jnp.einsum('bqk,bkd->bqd', p.astype(jnp.bfloat16), vh,
                         preferred_element_type=jnp.float32)       # (B, S, hd)
        ctx_heads.append(ctx.reshape(M, hd))

    # Single output projection with K = model_dim (one MXU pass instead of H
    # K=head_dim passes with sublane-sliced weights).
    ctx_all = jnp.concatenate(ctx_heads, axis=-1).astype(jnp.bfloat16)   # (M, D)
    out = jnp.dot(ctx_all, wo_ref[...],
                  preferred_element_type=jnp.float32) + bo_ref[...]
    # TODO(synk): if D stays at 32 in production, a lane-dense (>=128-wide)
    # output slab would avoid masked vst.msk stores; only worth it if profiling
    # shows the store path dominating.
    o_ref[...] = out.reshape(B, S, D).astype(o_ref.dtype)


def multi_head_self_attention(q, k, v, wq, bq, wk, bk, wv, bv, wo, bo,
                              *, num_heads=8, block_b=None):
    """Matches MultiHeadSelfAttention.forward (PyTorch Linear layout: W is (out, in))."""
    bs, S, D = q.shape
    assert D % num_heads == 0, "model_dim must be divisible by num_heads"
    head_dim = D // num_heads
    scale = 1.0 / math.sqrt(head_dim)

    # Batch-blocking: largest block that (a) still leaves >= 2 parallel grid
    # steps when bs >= 2 (keeps both v7x TensorCores busy), (b) divides bs, and
    # (c) keeps each f32 activation slab of the block small vs v7x's 64 MiB VMEM.
    if block_b is None:
        block_b = bs // 2 if bs >= 2 else 1
    vmem_cap = max(1, (2 * 1024 * 1024) // (S * D * 4))   # ~2 MiB per (M, D) slab
    block_b = max(1, min(block_b, vmem_cap, bs))
    while bs % block_b:
        block_b -= 1
    grid = (bs // block_b,)

    # Wrapper glue: transpose the tiny (D, D) weights so the kernel computes
    # x @ W^T as a plain row-major matmul, and pre-cast them to bf16 (native MXU
    # operand type, half the weight DMA bytes).  Biases stay f32.
    to_w = lambda w: w.T.astype(jnp.bfloat16)
    to_b = lambda b: b.reshape(1, D).astype(jnp.float32)

    kernel = functools.partial(_mhsa_kernel, num_heads=num_heads,
                               head_dim=head_dim, scale=scale)

    batch_spec = pl.BlockSpec((block_b, S, D), lambda i: (i, 0, 0))
    w_spec = pl.BlockSpec((D, D), lambda i: (0, 0))
    b_spec = pl.BlockSpec((1, D), lambda i: (0, 0))
    # TODO(synk): pipeline_mode=pl.Buffered(1) on the constant weight/bias specs
    # would halve their VMEM footprint at realistic model_dim.

    return pl.pallas_call(
        kernel,
        out_shape=jax.ShapeDtypeStruct((bs, S, D), q.dtype),
        grid=grid,
        in_specs=[
            batch_spec, batch_spec, batch_spec,          # q, k, v
            w_spec, w_spec, w_spec, w_spec,              # Wq^T, Wk^T, Wv^T, Wo^T (bf16)
            b_spec, b_spec, b_spec, b_spec,              # bq, bk, bv, bo (f32)
        ],
        out_specs=batch_spec,
        compiler_params=pltpu.CompilerParams(
            dimension_semantics=("parallel",),
            vmem_limit_bytes=32 * 1024 * 1024),
    )(q, k, v, to_w(wq), to_w(wk), to_w(wv), to_w(wo),
      to_b(bq), to_b(bk), to_b(bv), to_b(bo))


def _reference(q, k, v, wq, bq, wk, bk, wv, bv, wo, bo, num_heads):
    """Pure-JAX f32 mirror of the PyTorch module."""
    bs, S, D = q.shape
    hd = D // num_heads

    def lin(x, w, b):                      # PyTorch Linear: x @ W^T + b
        return jnp.einsum('bsd,ed->bse', x, w) + b

    Q = lin(q, wq, bq)
    K = lin(k, wk, bk)
    V = lin(v, wv, bv)

    def split(x):
        return x.reshape(bs, S, num_heads, hd).transpose(0, 2, 1, 3)

    Qh, Kh, Vh = split(Q), split(K), split(V)
    s = jnp.einsum('bhqd,bhkd->bhqk', Qh, Kh) / math.sqrt(hd)
    p = jax.nn.softmax(s, axis=-1)
    o = jnp.einsum('bhqk,bhkd->bhqd', p, Vh)
    o = o.transpose(0, 2, 1, 3).reshape(bs, S, D)
    return jnp.einsum('bsd,ed->bse', o, wo) + bo


if __name__ == "__main__":
    key = jax.random.PRNGKey(0)
    bs, seq_len, model_dim, num_heads = 2, 8, 32, 8

    ks = jax.random.split(key, 11)
    q = jax.random.normal(ks[0], (bs, seq_len, model_dim), jnp.float32)
    k = jax.random.normal(ks[1], (bs, seq_len, model_dim), jnp.float32)
    v = jax.random.normal(ks[2], (bs, seq_len, model_dim), jnp.float32)

    wscale = 1.0 / math.sqrt(model_dim)
    wq = jax.random.normal(ks[3], (model_dim, model_dim), jnp.float32) * wscale
    wk = jax.random.normal(ks[4], (model_dim, model_dim), jnp.float32) * wscale
    wv = jax.random.normal(ks[5], (model_dim, model_dim), jnp.float32) * wscale
    wo = jax.random.normal(ks[6], (model_dim, model_dim), jnp.float32) * wscale
    bq = jax.random.normal(ks[7], (model_dim,), jnp.float32) * 0.1
    bk = jax.random.normal(ks[8], (model_dim,), jnp.float32) * 0.1
    bv = jax.random.normal(ks[9], (model_dim,), jnp.float32) * 0.1
    bo = jax.random.normal(ks[10], (model_dim,), jnp.float32) * 0.1

    out = multi_head_self_attention(q, k, v, wq, bq, wk, bk, wv, bv, wo, bo,
                                    num_heads=num_heads)
    out = jax.block_until_ready(out)

    ref = _reference(q, k, v, wq, bq, wk, bk, wv, bv, wo, bo, num_heads)
    assert out.shape == (bs, seq_len, model_dim)
    max_err = jnp.max(jnp.abs(out - ref))
    # bf16 MXU operands (f32 accumulation) vs full-f32 reference -> looser
    # tolerance than the old all-f32 kernel; a real bug would be O(0.5-1).
    assert jnp.allclose(out, ref, atol=1e-1, rtol=1e-1), f"max err {max_err}"
    print("KERNEL_OK")
</pallas_src>

<mosaic_0001>
module attributes {stable_mosaic.version = 11 : i64} {
  func.func @_mhsa_kernel(%arg0: i32, %arg1: memref<1x8x32xf32, #tpu.memory_space<vmem>>, %arg2: memref<1x8x32xf32, #tpu.memory_space<vmem>>, %arg3: memref<1x8x32xf32, #tpu.memory_space<vmem>>, %arg4: memref<32x32xbf16, #tpu.memory_space<vmem>>, %arg5: memref<32x32xbf16, #tpu.memory_space<vmem>>, %arg6: memref<32x32xbf16, #tpu.memory_space<vmem>>, %arg7: memref<32x32xbf16, #tpu.memory_space<vmem>>, %arg8: memref<1x32xf32, #tpu.memory_space<vmem>>, %arg9: memref<1x32xf32, #tpu.memory_space<vmem>>, %arg10: memref<1x32xf32, #tpu.memory_space<vmem>>, %arg11: memref<1x32xf32, #tpu.memory_space<vmem>>, %arg12: memref<1x8x32xf32, #tpu.memory_space<vmem>>) attributes {dimension_semantics = [#tpu.dimension_semantics<parallel>], iteration_bounds = array<i64: 2>, scalar_prefetch = 0 : i64, scratch_operands = 0 : i64, tpu.core_type = #tpu.core_type<tc>, window_params = [{transform_indices = @transform_0, window_bounds = array<i64: 1, 8, 32>}, {transform_indices = @transform_1, window_bounds = array<i64: 1, 8, 32>}, {transform_indices = @transform_2, window_bounds = array<i64: 1, 8, 32>}, {pipeline_mode = #tpu.pipeline_mode<synchronous>, transform_indices = @transform_3, window_bounds = array<i64: 32, 32>}, {pipeline_mode = #tpu.pipeline_mode<synchronous>, transform_indices = @transform_4, window_bounds = array<i64: 32, 32>}, {pipeline_mode = #tpu.pipeline_mode<synchronous>, transform_indices = @transform_5, window_bounds = array<i64: 32, 32>}, {pipeline_mode = #tpu.pipeline_mode<synchronous>, transform_indices = @transform_6, window_bounds = array<i64: 32, 32>}, {pipeline_mode = #tpu.pipeline_mode<synchronous>, transform_indices = @transform_7, window_bounds = array<i64: 1, 32>}, {pipeline_mode = #tpu.pipeline_mode<synchronous>, transform_indices = @transform_8, window_bounds = array<i64: 1, 32>}, {pipeline_mode = #tpu.pipeline_mode<synchronous>, transform_indices = @transform_9, window_bounds = array<i64: 1, 32>}, {pipeline_mode = #tpu.pipeline_mode<synchronous>, transform_indices = @transform_10, window_bounds = array<i64: 1, 32>}, {transform_indices = @transform_11, window_bounds = array<i64: 1, 8, 32>}]} {
    %c0 = arith.constant 0 : index
    %c0_0 = arith.constant 0 : index
    %c0_1 = arith.constant 0 : index
    %0 = vector.load %arg1[%c0, %c0_0, %c0_1] : memref<1x8x32xf32, #tpu.memory_space<vmem>>, vector<1x8x32xf32>
    %1 = vector.shape_cast %0 : vector<1x8x32xf32> to vector<8x32xf32>
    %2 = arith.truncf %1 : vector<8x32xf32> to vector<8x32xbf16>
    %c0_2 = arith.constant 0 : index
    %c0_3 = arith.constant 0 : index
    %3 = vector.load %arg4[%c0_2, %c0_3] : memref<32x32xbf16, #tpu.memory_space<vmem>>, vector<32x32xbf16>
    %cst = arith.constant dense<0.000000e+00> : vector<8x32xf32>
    %4 = tpu.matmul %2, %3, %cst {dimension_numbers = #tpu.dot_dimension_numbers<[1], [0], [0], [1], [0, 0, 1, 1], [], []>} : vector<8x32xbf16>, vector<32x32xbf16>, vector<8x32xf32> -> vector<8x32xf32>
    %c0_4 = arith.constant 0 : index
    %c0_5 = arith.constant 0 : index
    %5 = vector.load %arg8[%c0_4, %c0_5] : memref<1x32xf32, #tpu.memory_space<vmem>>, vector<1x32xf32>
    %6 = vector.broadcast %5 : vector<1x32xf32> to vector<8x32xf32>
    %7 = arith.addf %4, %6 : vector<8x32xf32>
    %cst_6 = arith.constant 5.000000e-01 : f32
    %8 = vector.broadcast %cst_6 : f32 to vector<8x32xf32>
    %9 = arith.mulf %7, %8 : vector<8x32xf32>
    %c0_7 = arith.constant 0 : index
    %c0_8 = arith.constant 0 : index
    %c0_9 = arith.constant 0 : index
    %10 = vector.load %arg2[%c0_7, %c0_8, %c0_9] : memref<1x8x32xf32, #tpu.memory_space<vmem>>, vector<1x8x32xf32>
    %11 = vector.shape_cast %10 : vector<1x8x32xf32> to vector<8x32xf32>
    %12 = arith.truncf %11 : vector<8x32xf32> to vector<8x32xbf16>
    %c0_10 = arith.constant 0 : index
    %c0_11 = arith.constant 0 : index
    %13 = vector.load %arg5[%c0_10, %c0_11] : memref<32x32xbf16, #tpu.memory_space<vmem>>, vector<32x32xbf16>
    %cst_12 = arith.constant dense<0.000000e+00> : vector<8x32xf32>
    %14 = tpu.matmul %12, %13, %cst_12 {dimension_numbers = #tpu.dot_dimension_numbers<[1], [0], [0], [1], [0, 0, 1, 1], [], []>} : vector<8x32xbf16>, vector<32x32xbf16>, vector<8x32xf32> -> vector<8x32xf32>
    %c0_13 = arith.constant 0 : index
    %c0_14 = arith.constant 0 : index
    %15 = vector.load %arg9[%c0_13, %c0_14] : memref<1x32xf32, #tpu.memory_space<vmem>>, vector<1x32xf32>
    %16 = vector.broadcast %15 : vector<1x32xf32> to vector<8x32xf32>
    %17 = arith.addf %14, %16 : vector<8x32xf32>
    %c0_15 = arith.constant 0 : index
    %c0_16 = arith.constant 0 : index
    %c0_17 = arith.constant 0 : index
    %18 = vector.load %arg3[%c0_15, %c0_16, %c0_17] : memref<1x8x32xf32, #tpu.memory_space<vmem>>, vector<1x8x32xf32>
    %19 = vector.shape_cast %18 : vector<1x8x32xf32> to vector<8x32xf32>
    %20 = arith.truncf %19 : vector<8x32xf32> to vector<8x32xbf16>
    %c0_18 = arith.constant 0 : index
    %c0_19 = arith.constant 0 : index
    %21 = vector.load %arg6[%c0_18, %c0_19] : memref<32x32xbf16, #tpu.memory_space<vmem>>, vector<32x32xbf16>
    %cst_20 = arith.constant dense<0.000000e+00> : vector<8x32xf32>
    %22 = tpu.matmul %20, %21, %cst_20 {dimension_numbers = #tpu.dot_dimension_numbers<[1], [0], [0], [1], [0, 0, 1, 1], [], []>} : vector<8x32xbf16>, vector<32x32xbf16>, vector<8x32xf32> -> vector<8x32xf32>
    %c0_21 = arith.constant 0 : index
    %c0_22 = arith.constant 0 : index
    %23 = vector.load %arg10[%c0_21, %c0_22] : memref<1x32xf32, #tpu.memory_space<vmem>>, vector<1x32xf32>
    %24 = vector.broadcast %23 : vector<1x32xf32> to vector<8x32xf32>
    %25 = arith.addf %22, %24 : vector<8x32xf32>
    %26 = vector.extract_strided_slice %9 {offsets = [0, 0], sizes = [8, 4], strides = [1, 1]} : vector<8x32xf32> to vector<8x4xf32>
    %27 = arith.truncf %26 : vector<8x4xf32> to vector<8x4xbf16>
    %28 = vector.shape_cast %27 : vector<8x4xbf16> to vector<1x8x4xbf16>
    %29 = vector.extract_strided_slice %17 {offsets = [0, 0], sizes = [8, 4], strides = [1, 1]} : vector<8x32xf32> to vector<8x4xf32>
    %30 = arith.truncf %29 : vector<8x4xf32> to vector<8x4xbf16>
    %31 = vector.shape_cast %30 : vector<8x4xbf16> to vector<1x8x4xbf16>
    %32 = vector.extract_strided_slice %25 {offsets = [0, 0], sizes = [8, 4], strides = [1, 1]} : vector<8x32xf32> to vector<8x4xf32>
    %33 = arith.truncf %32 : vector<8x4xf32> to vector<8x4xbf16>
    %34 = vector.shape_cast %33 : vector<8x4xbf16> to vector<1x8x4xbf16>
    "tpu.trace_start"() <{level = 10 : i32, message = "bqd,bkd->bqk"}> : () -> ()
    %cst_23 = arith.constant dense<0.000000e+00> : vector<1x8x8xf32>
    %35 = tpu.matmul %28, %31, %cst_23 {dimension_numbers = #tpu.dot_dimension_numbers<[2], [2], [1], [1], [0, 0, 0, 1, 1, 1], [0], [0]>} : vector<1x8x4xbf16>, vector<1x8x4xbf16>, vector<1x8x8xf32> -> vector<1x8x8xf32>
    "tpu.trace_stop"() : () -> ()
    %cst_24 = arith.constant dense<0xFF800000> : vector<1x8xf32>
    %36 = vector.multi_reduction <maximumf>, %35, %cst_24 [2] : vector<1x8x8xf32> to vector<1x8xf32>
    %37 = vector.shape_cast %36 : vector<1x8xf32> to vector<1x8x1xf32>
    %38 = vector.broadcast %37 : vector<1x8x1xf32> to vector<1x8x8xf32>
    %39 = arith.subf %35, %38 : vector<1x8x8xf32>
    %40 = math.exp %39 : vector<1x8x8xf32>
    %cst_25 = arith.constant dense<0.000000e+00> : vector<1x8xf32>
    %41 = vector.multi_reduction <add>, %40, %cst_25 [2] : vector<1x8x8xf32> to vector<1x8xf32>
    %42 = vector.shape_cast %41 : vector<1x8xf32> to vector<1x8x1xf32>
    %43 = tpu.reciprocal %42 {approx = true} : vector<1x8x1xf32> -> vector<1x8x1xf32>
    %44 = vector.broadcast %43 : vector<1x8x1xf32> to vector<1x8x8xf32>
    %45 = arith.mulf %40, %44 : vector<1x8x8xf32>
    %46 = arith.truncf %45 : vector<1x8x8xf32> to vector<1x8x8xbf16>
    "tpu.trace_start"() <{level = 10 : i32, message = "bqk,bkd->bqd"}> : () -> ()
    %cst_26 = arith.constant dense<0.000000e+00> : vector<1x8x4xf32>
    %47 = tpu.matmul %46, %34, %cst_26 {dimension_numbers = #tpu.dot_dimension_numbers<[2], [1], [1], [2], [0, 0, 0, 1, 1, 2], [0], [0]>} : vector<1x8x8xbf16>, vector<1x8x4xbf16>, vector<1x8x4xf32> -> vector<1x8x4xf32>
    "tpu.trace_stop"() : () -> ()
    %48 = vector.shape_cast %47 : vector<1x8x4xf32> to vector<8x4xf32>
    %49 = vector.extract_strided_slice %9 {offsets = [0, 4], sizes = [8, 4], strides = [1, 1]} : vector<8x32xf32> to vector<8x4xf32>
    %50 = arith.truncf %49 : vector<8x4xf32> to vector<8x4xbf16>
    %51 = vector.shape_cast %50 : vector<8x4xbf16> to vector<1x8x4xbf16>
    %52 = vector.extract_strided_slice %17 {offsets = [0, 4], sizes = [8, 4], strides = [1, 1]} : vector<8x32xf32> to vector<8x4xf32>
    %53 = arith.truncf %52 : vector<8x4xf32> to vector<8x4xbf16>
    %54 = vector.shape_cast %53 : vector<8x4xbf16> to vector<1x8x4xbf16>
    %55 = vector.extract_strided_slice %25 {offsets = [0, 4], sizes = [8, 4], strides = [1, 1]} : vector<8x32xf32> to vector<8x4xf32>
    %56 = arith.truncf %55 : vector<8x4xf32> to vector<8x4xbf16>
    %57 = vector.shape_cast %56 : vector<8x4xbf16> to vector<1x8x4xbf16>
    "tpu.trace_start"() <{level = 10 : i32, message = "bqd,bkd->bqk"}> : () -> ()
    %cst_27 = arith.constant dense<0.000000e+00> : vector<1x8x8xf32>
    %58 = tpu.matmul %51, %54, %cst_27 {dimension_numbers = #tpu.dot_dimension_numbers<[2], [2], [1], [1], [0, 0, 0, 1, 1, 1], [0], [0]>} : vector<1x8x4xbf16>, vector<1x8x4xbf16>, vector<1x8x8xf32> -> vector<1x8x8xf32>
    "tpu.trace_stop"() : () -> ()
    %cst_28 = arith.constant dense<0xFF800000> : vector<1x8xf32>
    %59 = vector.multi_reduction <maximumf>, %58, %cst_28 [2] : vector<1x8x8xf32> to vector<1x8xf32>
    %60 = vector.shape_cast %59 : vector<1x8xf32> to vector<1x8x1xf32>
    %61 = vector.broadcast %60 : vector<1x8x1xf32> to vector<1x8x8xf32>
    %62 = arith.subf %58, %61 : vector<1x8x8xf32>
    %63 = math.exp %62 : vector<1x8x8xf32>
    %cst_29 = arith.constant dense<0.000000e+00> : vector<1x8xf32>
    %64 = vector.multi_reduction <add>, %63, %cst_29 [2] : vector<1x8x8xf32> to vector<1x8xf32>
    %65 = vector.shape_cast %64 : vector<1x8xf32> to vector<1x8x1xf32>
    %66 = tpu.reciprocal %65 {approx = true} : vector<1x8x1xf32> -> vector<1x8x1xf32>
    %67 = vector.broadcast %66 : vector<1x8x1xf32> to vector<1x8x8xf32>
    %68 = arith.mulf %63, %67 : vector<1x8x8xf32>
    %69 = arith.truncf %68 : vector<1x8x8xf32> to vector<1x8x8xbf16>
    "tpu.trace_start"() <{level = 10 : i32, message = "bqk,bkd->bqd"}> : () -> ()
    %cst_30 = arith.constant dense<0.000000e+00> : vector<1x8x4xf32>
    %70 = tpu.matmul %69, %57, %cst_30 {dimension_numbers = #tpu.dot_dimension_numbers<[2], [1], [1], [2], [0, 0, 0, 1, 1, 2], [0], [0]>} : vector<1x8x8xbf16>, vector<1x8x4xbf16>, vector<1x8x4xf32> -> vector<1x8x4xf32>
    "tpu.trace_stop"() : () -> ()
    %71 = vector.shape_cast %70 : vector<1x8x4xf32> to vector<8x4xf32>
    %72 = vector.extract_strided_slice %9 {offsets = [0, 8], sizes = [8, 4], strides = [1, 1]} : vector<8x32xf32> to vector<8x4xf32>
    %73 = arith.truncf %72 : vector<8x4xf32> to vector<8x4xbf16>
    %74 = vector.shape_cast %73 : vector<8x4xbf16> to vector<1x8x4xbf16>
    %75 = vector.extract_strided_slice %17 {offsets = [0, 8], sizes = [8, 4], strides = [1, 1]} : vector<8x32xf32> to vector<8x4xf32>
    %76 = arith.truncf %75 : vector<8x4xf32> to vector<8x4xbf16>
    %77 = vector.shape_cast %76 : vector<8x4xbf16> to vector<1x8x4xbf16>
    %78 = vector.extract_strided_slice %25 {offsets = [0, 8], sizes = [8, 4], strides = [1, 1]} : vector<8x32xf32> to vector<8x4xf32>
    %79 = arith.truncf %78 : vector<8x4xf32> to vector<8x4xbf16>
    %80 = vector.shape_cast %79 : vector<8x4xbf16> to vector<1x8x4xbf16>
    "tpu.trace_start"() <{level = 10 : i32, message = "bqd,bkd->bqk"}> : () -> ()
    %cst_31 = arith.constant dense<0.000000e+00> : vector<1x8x8xf32>
    %81 = tpu.matmul %74, %77, %cst_31 {dimension_numbers = #tpu.dot_dimension_numbers<[2], [2], [1], [1], [0, 0, 0, 1, 1, 1], [0], [0]>} : vector<1x8x4xbf16>, vector<1x8x4xbf16>, vector<1x8x8xf32> -> vector<1x8x8xf32>
    "tpu.trace_stop"() : () -> ()
    %cst_32 = arith.constant dense<0xFF800000> : vector<1x8xf32>
    %82 = vector.multi_reduction <maximumf>, %81, %cst_32 [2] : vector<1x8x8xf32> to vector<1x8xf32>
    %83 = vector.shape_cast %82 : vector<1x8xf32> to vector<1x8x1xf32>
    %84 = vector.broadcast %83 : vector<1x8x1xf32> to vector<1x8x8xf32>
    %85 = arith.subf %81, %84 : vector<1x8x8xf32>
    %86 = math.exp %85 : vector<1x8x8xf32>
    %cst_33 = arith.constant dense<0.000000e+00> : vector<1x8xf32>
    %87 = vector.multi_reduction <add>, %86, %cst_33 [2] : vector<1x8x8xf32> to vector<1x8xf32>
    %88 = vector.shape_cast %87 : vector<1x8xf32> to vector<1x8x1xf32>
    %89 = tpu.reciprocal %88 {approx = true} : vector<1x8x1xf32> -> vector<1x8x1xf32>
    %90 = vector.broadcast %89 : vector<1x8x1xf32> to vector<1x8x8xf32>
    %91 = arith.mulf %86, %90 : vector<1x8x8xf32>
    %92 = arith.truncf %91 : vector<1x8x8xf32> to vector<1x8x8xbf16>
    "tpu.trace_start"() <{level = 10 : i32, message = "bqk,bkd->bqd"}> : () -> ()
    %cst_34 = arith.constant dense<0.000000e+00> : vector<1x8x4xf32>
    %93 = tpu.matmul %92, %80, %cst_34 {dimension_numbers = #tpu.dot_dimension_numbers<[2], [1], [1], [2], [0, 0, 0, 1, 1, 2], [0], [0]>} : vector<1x8x8xbf16>, vector<1x8x4xbf16>, vector<1x8x4xf32> -> vector<1x8x4xf32>
    "tpu.trace_stop"() : () -> ()
    %94 = vector.shape_cast %93 : vector<1x8x4xf32> to vector<8x4xf32>
    %95 = vector.extract_strided_slice %9 {offsets = [0, 12], sizes = [8, 4], strides = [1, 1]} : vector<8x32xf32> to vector<8x4xf32>
    %96 = arith.truncf %95 : vector<8x4xf32> to vector<8x4xbf16>
    %97 = vector.shape_cast %96 : vector<8x4xbf16> to vector<1x8x4xbf16>
    %98 = vector.extract_strided_slice %17 {offsets = [0, 12], sizes = [8, 4], strides = [1, 1]} : vector<8x32xf32> to vector<8x4xf32>
    %99 = arith.truncf %98 : vector<8x4xf32> to vector<8x4xbf16>
    %100 = vector.shape_cast %99 : vector<8x4xbf16> to vector<1x8x4xbf16>
    %101 = vector.extract_strided_slice %25 {offsets = [0, 12], sizes = [8, 4], strides = [1, 1]} : vector<8x32xf32> to vector<8x4xf32>
    %102 = arith.truncf %101 : vector<8x4xf32> to vector<8x4xbf16>
    %103 = vector.shape_cast %102 : vector<8x4xbf16> to vector<1x8x4xbf16>
    "tpu.trace_start"() <{level = 10 : i32, message = "bqd,bkd->bqk"}> : () -> ()
    %cst_35 = arith.constant dense<0.000000e+00> : vector<1x8x8xf32>
    %104 = tpu.matmul %97, %100, %cst_35 {dimension_numbers = #tpu.dot_dimension_numbers<[2], [2], [1], [1], [0, 0, 0, 1, 1, 1], [0], [0]>} : vector<1x8x4xbf16>, vector<1x8x4xbf16>, vector<1x8x8xf32> -> vector<1x8x8xf32>
    "tpu.trace_stop"() : () -> ()
    %cst_36 = arith.constant dense<0xFF800000> : vector<1x8xf32>
    %105 = vector.multi_reduction <maximumf>, %104, %cst_36 [2] : vector<1x8x8xf32> to vector<1x8xf32>
    %106 = vector.shape_cast %105 : vector<1x8xf32> to vector<1x8x1xf32>
    %107 = vector.broadcast %106 : vector<1x8x1xf32> to vector<1x8x8xf32>
    %108 = arith.subf %104, %107 : vector<1x8x8xf32>
    %109 = math.exp %108 : vector<1x8x8xf32>
    %cst_37 = arith.constant dense<0.000000e+00> : vector<1x8xf32>
    %110 = vector.multi_reduction <add>, %109, %cst_37 [2] : vector<1x8x8xf32> to vector<1x8xf32>
    %111 = vector.shape_cast %110 : vector<1x8xf32> to vector<1x8x1xf32>
    %112 = tpu.reciprocal %111 {approx = true} : vector<1x8x1xf32> -> vector<1x8x1xf32>
    %113 = vector.broadcast %112 : vector<1x8x1xf32> to vector<1x8x8xf32>
    %114 = arith.mulf %109, %113 : vector<1x8x8xf32>
    %115 = arith.truncf %114 : vector<1x8x8xf32> to vector<1x8x8xbf16>
    "tpu.trace_start"() <{level = 10 : i32, message = "bqk,bkd->bqd"}> : () -> ()
    %cst_38 = arith.constant dense<0.000000e+00> : vector<1x8x4xf32>
    %116 = tpu.matmul %115, %103, %cst_38 {dimension_numbers = #tpu.dot_dimension_numbers<[2], [1], [1], [2], [0, 0, 0, 1, 1, 2], [0], [0]>} : vector<1x8x8xbf16>, vector<1x8x4xbf16>, vector<1x8x4xf32> -> vector<1x8x4xf32>
    "tpu.trace_stop"() : () -> ()
    %117 = vector.shape_cast %116 : vector<1x8x4xf32> to vector<8x4xf32>
    %118 = vector.extract_strided_slice %9 {offsets = [0, 16], sizes = [8, 4], strides = [1, 1]} : vector<8x32xf32> to vector<8x4xf32>
    %119 = arith.truncf %118 : vector<8x4xf32> to vector<8x4xbf16>
    %120 = vector.shape_cast %119 : vector<8x4xbf16> to vector<1x8x4xbf16>
    %121 = vector.extract_strided_slice %17 {offsets = [0, 16], sizes = [8, 4], strides = [1, 1]} : vector<8x32xf32> to vector<8x4xf32>
    %122 = arith.truncf %121 : vector<8x4xf32> to vector<8x4xbf16>
    %123 = vector.shape_cast %122 : vector<8x4xbf16> to vector<1x8x4xbf16>
    %124 = vector.extract_strided_slice %25 {offsets = [0, 16], sizes = [8, 4], strides = [1, 1]} : vector<8x32xf32> to vector<8x4xf32>
    %125 = arith.truncf %124 : vector<8x4xf32> to vector<8x4xbf16>
    %126 = vector.shape_cast %125 : vector<8x4xbf16> to vector<1x8x4xbf16>
    "tpu.trace_start"() <{level = 10 : i32, message = "bqd,bkd->bqk"}> : () -> ()
    %cst_39 = arith.constant dense<0.000000e+00> : vector<1x8x8xf32>
    %127 = tpu.matmul %120, %123, %cst_39 {dimension_numbers = #tpu.dot_dimension_numbers<[2], [2], [1], [1], [0, 0, 0, 1, 1, 1], [0], [0]>} : vector<1x8x4xbf16>, vector<1x8x4xbf16>, vector<1x8x8xf32> -> vector<1x8x8xf32>
    "tpu.trace_stop"() : () -> ()
    %cst_40 = arith.constant dense<0xFF800000> : vector<1x8xf32>
    %128 = vector.multi_reduction <maximumf>, %127, %cst_40 [2] : vector<1x8x8xf32> to vector<1x8xf32>
    %129 = vector.shape_cast %128 : vector<1x8xf32> to vector<1x8x1xf32>
    %130 = vector.broadcast %129 : vector<1x8x1xf32> to vector<1x8x8xf32>
    %131 = arith.subf %127, %130 : vector<1x8x8xf32>
    %132 = math.exp %131 : vector<1x8x8xf32>
    %cst_41 = arith.constant dense<0.000000e+00> : vector<1x8xf32>
    %133 = vector.multi_reduction <add>, %132, %cst_41 [2] : vector<1x8x8xf32> to vector<1x8xf32>
    %134 = vector.shape_cast %133 : vector<1x8xf32> to vector<1x8x1xf32>
    %135 = tpu.reciprocal %134 {approx = true} : vector<1x8x1xf32> -> vector<1x8x1xf32>
    %136 = vector.broadcast %135 : vector<1x8x1xf32> to vector<1x8x8xf32>
    %137 = arith.mulf %132, %136 : vector<1x8x8xf32>
    %138 = arith.truncf %137 : vector<1x8x8xf32> to vector<1x8x8xbf16>
    "tpu.trace_start"() <{level = 10 : i32, message = "bqk,bkd->bqd"}> : () -> ()
    %cst_42 = arith.constant dense<0.000000e+00> : vector<1x8x4xf32>
    %139 = tpu.matmul %138, %126, %cst_42 {dimension_numbers = #tpu.dot_dimension_numbers<[2], [1], [1], [2], [0, 0, 0, 1, 1, 2], [0], [0]>} : vector<1x8x8xbf16>, vector<1x8x4xbf16>, vector<1x8x4xf32> -> vector<1x8x4xf32>
    "tpu.trace_stop"() : () -> ()
    %140 = vector.shape_cast %139 : vector<1x8x4xf32> to vector<8x4xf32>
    %141 = vector.extract_strided_slice %9 {offsets = [0, 20], sizes = [8, 4], strides = [1, 1]} : vector<8x32xf32> to vector<8x4xf32>
    %142 = arith.truncf %141 : vector<8x4xf32> to vector<8x4xbf16>
    %143 = vector.shape_cast %142 : vector<8x4xbf16> to vector<1x8x4xbf16>
    %144 = vector.extract_strided_slice %17 {offsets = [0, 20], sizes = [8, 4], strides = [1, 1]} : vector<8x32xf32> to vector<8x4xf32>
    %145 = arith.truncf %144 : vector<8x4xf32> to vector<8x4xbf16>
    %146 = vector.shape_cast %145 : vector<8x4xbf16> to vector<1x8x4xbf16>
    %147 = vector.extract_strided_slice %25 {offsets = [0, 20], sizes = [8, 4], strides = [1, 1]} : vector<8x32xf32> to vector<8x4xf32>
    %148 = arith.truncf %147 : vector<8x4xf32> to vector<8x4xbf16>
    %149 = vector.shape_cast %148 : vector<8x4xbf16> to vector<1x8x4xbf16>
    "tpu.trace_start"() <{level = 10 : i32, message = "bqd,bkd->bqk"}> : () -> ()
    %cst_43 = arith.constant dense<0.000000e+00> : vector<1x8x8xf32>
    %150 = tpu.matmul %143, %146, %cst_43 {dimension_numbers = #tpu.dot_dimension_numbers<[2], [2], [1], [1], [0, 0, 0, 1, 1, 1], [0], [0]>} : vector<1x8x4xbf16>, vector<1x8x4xbf16>, vector<1x8x8xf32> -> vector<1x8x8xf32>
    "tpu.trace_stop"() : () -> ()
    %cst_44 = arith.constant dense<0xFF800000> : vector<1x8xf32>
    %151 = vector.multi_reduction <maximumf>, %150, %cst_44 [2] : vector<1x8x8xf32> to vector<1x8xf32>
    %152 = vector.shape_cast %151 : vector<1x8xf32> to vector<1x8x1xf32>
    %153 = vector.broadcast %152 : vector<1x8x1xf32> to vector<1x8x8xf32>
    %154 = arith.subf %150, %153 : vector<1x8x8xf32>
    %155 = math.exp %154 : vector<1x8x8xf32>
    %cst_45 = arith.constant dense<0.000000e+00> : vector<1x8xf32>
    %156 = vector.multi_reduction <add>, %155, %cst_45 [2] : vector<1x8x8xf32> to vector<1x8xf32>
    %157 = vector.shape_cast %156 : vector<1x8xf32> to vector<1x8x1xf32>
    %158 = tpu.reciprocal %157 {approx = true} : vector<1x8x1xf32> -> vector<1x8x1xf32>
    %159 = vector.broadcast %158 : vector<1x8x1xf32> to vector<1x8x8xf32>
    %160 = arith.mulf %155, %159 : vector<1x8x8xf32>
    %161 = arith.truncf %160 : vector<1x8x8xf32> to vector<1x8x8xbf16>
    "tpu.trace_start"() <{level = 10 : i32, message = "bqk,bkd->bqd"}> : () -> ()
    %cst_46 = arith.constant dense<0.000000e+00> : vector<1x8x4xf32>
    %162 = tpu.matmul %161, %149, %cst_46 {dimension_numbers = #tpu.dot_dimension_numbers<[2], [1], [1], [2], [0, 0, 0, 1, 1, 2], [0], [0]>} : vector<1x8x8xbf16>, vector<1x8x4xbf16>, vector<1x8x4xf32> -> vector<1x8x4xf32>
    "tpu.trace_stop"() : () -> ()
    %163 = vector.shape_cast %162 : vector<1x8x4xf32> to vector<8x4xf32>
    %164 = vector.extract_strided_slice %9 {offsets = [0, 24], sizes = [8, 4], strides = [1, 1]} : vector<8x32xf32> to vector<8x4xf32>
    %165 = arith.truncf %164 : vector<8x4xf32> to vector<8x4xbf16>
    %166 = vector.shape_cast %165 : vector<8x4xbf16> to vector<1x8x4xbf16>
    %167 = vector.extract_strided_slice %17 {offsets = [0, 24], sizes = [8, 4], strides = [1, 1]} : vector<8x32xf32> to vector<8x4xf32>
    %168 = arith.truncf %167 : vector<8x4xf32> to vector<8x4xbf16>
    %169 = vector.shape_cast %168 : vector<8x4xbf16> to vector<1x8x4xbf16>
    %170 = vector.extract_strided_slice %25 {offsets = [0, 24], sizes = [8, 4], strides = [1, 1]} : vector<8x32xf32> to vector<8x4xf32>
    %171 = arith.truncf %170 : vector<8x4xf32> to vector<8x4xbf16>
    %172 = vector.shape_cast %171 : vector<8x4xbf16> to vector<1x8x4xbf16>
    "tpu.trace_start"() <{level = 10 : i32, message = "bqd,bkd->bqk"}> : () -> ()
    %cst_47 = arith.constant dense<0.000000e+00> : vector<1x8x8xf32>
    %173 = tpu.matmul %166, %169, %cst_47 {dimension_numbers = #tpu.dot_dimension_numbers<[2], [2], [1], [1], [0, 0, 0, 1, 1, 1], [0], [0]>} : vector<1x8x4xbf16>, vector<1x8x4xbf16>, vector<1x8x8xf32> -> vector<1x8x8xf32>
    "tpu.trace_stop"() : () -> ()
    %cst_48 = arith.constant dense<0xFF800000> : vector<1x8xf32>
    %174 = vector.multi_reduction <maximumf>, %173, %cst_48 [2] : vector<1x8x8xf32> to vector<1x8xf32>
    %175 = vector.shape_cast %174 : vector<1x8xf32> to vector<1x8x1xf32>
    %176 = vector.broadcast %175 : vector<1x8x1xf32> to vector<1x8x8xf32>
    %177 = arith.subf %173, %176 : vector<1x8x8xf32>
    %178 = math.exp %177 : vector<1x8x8xf32>
    %cst_49 = arith.constant dense<0.000000e+00> : vector<1x8xf32>
    %179 = vector.multi_reduction <add>, %178, %cst_49 [2] : vector<1x8x8xf32> to vector<1x8xf32>
    %180 = vector.shape_cast %179 : vector<1x8xf32> to vector<1x8x1xf32>
    %181 = tpu.reciprocal %180 {approx = true} : vector<1x8x1xf32> -> vector<1x8x1xf32>
    %182 = vector.broadcast %181 : vector<1x8x1xf32> to vector<1x8x8xf32>
    %183 = arith.mulf %178, %182 : vector<1x8x8xf32>
    %184 = arith.truncf %183 : vector<1x8x8xf32> to vector<1x8x8xbf16>
    "tpu.trace_start"() <{level = 10 : i32, message = "bqk,bkd->bqd"}> : () -> ()
    %cst_50 = arith.constant dense<0.000000e+00> : vector<1x8x4xf32>
    %185 = tpu.matmul %184, %172, %cst_50 {dimension_numbers = #tpu.dot_dimension_numbers<[2], [1], [1], [2], [0, 0, 0, 1, 1, 2], [0], [0]>} : vector<1x8x8xbf16>, vector<1x8x4xbf16>, vector<1x8x4xf32> -> vector<1x8x4xf32>
    "tpu.trace_stop"() : () -> ()
    %186 = vector.shape_cast %185 : vector<1x8x4xf32> to vector<8x4xf32>
    %187 = vector.extract_strided_slice %9 {offsets = [0, 28], sizes = [8, 4], strides = [1, 1]} : vector<8x32xf32> to vector<8x4xf32>
    %188 = arith.truncf %187 : vector<8x4xf32> to vector<8x4xbf16>
    %189 = vector.shape_cast %188 : vector<8x4xbf16> to vector<1x8x4xbf16>
    %190 = vector.extract_strided_slice %17 {offsets = [0, 28], sizes = [8, 4], strides = [1, 1]} : vector<8x32xf32> to vector<8x4xf32>
    %191 = arith.truncf %190 : vector<8x4xf32> to vector<8x4xbf16>
    %192 = vector.shape_cast %191 : vector<8x4xbf16> to vector<1x8x4xbf16>
    %193 = vector.extract_strided_slice %25 {offsets = [0, 28], sizes = [8, 4], strides = [1, 1]} : vector<8x32xf32> to vector<8x4xf32>
    %194 = arith.truncf %193 : vector<8x4xf32> to vector<8x4xbf16>
    %195 = vector.shape_cast %194 : vector<8x4xbf16> to vector<1x8x4xbf16>
    "tpu.trace_start"() <{level = 10 : i32, message = "bqd,bkd->bqk"}> : () -> ()
    %cst_51 = arith.constant dense<0.000000e+00> : vector<1x8x8xf32>
    %196 = tpu.matmul %189, %192, %cst_51 {dimension_numbers = #tpu.dot_dimension_numbers<[2], [2], [1], [1], [0, 0, 0, 1, 1, 1], [0], [0]>} : vector<1x8x4xbf16>, vector<1x8x4xbf16>, vector<1x8x8xf32> -> vector<1x8x8xf32>
    "tpu.trace_stop"() : () -> ()
    %cst_52 = arith.constant dense<0xFF800000> : vector<1x8xf32>
    %197 = vector.multi_reduction <maximumf>, %196, %cst_52 [2] : vector<1x8x8xf32> to vector<1x8xf32>
    %198 = vector.shape_cast %197 : vector<1x8xf32> to vector<1x8x1xf32>
    %199 = vector.broadcast %198 : vector<1x8x1xf32> to vector<1x8x8xf32>
    %200 = arith.subf %196, %199 : vector<1x8x8xf32>
    %201 = math.exp %200 : vector<1x8x8xf32>
    %cst_53 = arith.constant dense<0.000000e+00> : vector<1x8xf32>
    %202 = vector.multi_reduction <add>, %201, %cst_53 [2] : vector<1x8x8xf32> to vector<1x8xf32>
    %203 = vector.shape_cast %202 : vector<1x8xf32> to vector<1x8x1xf32>
    %204 = tpu.reciprocal %203 {approx = true} : vector<1x8x1xf32> -> vector<1x8x1xf32>
    %205 = vector.broadcast %204 : vector<1x8x1xf32> to vector<1x8x8xf32>
    %206 = arith.mulf %201, %205 : vector<1x8x8xf32>
    %207 = arith.truncf %206 : vector<1x8x8xf32> to vector<1x8x8xbf16>
    "tpu.trace_start"() <{level = 10 : i32, message = "bqk,bkd->bqd"}> : () -> ()
    %cst_54 = arith.constant dense<0.000000e+00> : vector<1x8x4xf32>
    %208 = tpu.matmul %207, %195, %cst_54 {dimension_numbers = #tpu.dot_dimension_numbers<[2], [1], [1], [2], [0, 0, 0, 1, 1, 2], [0], [0]>} : vector<1x8x8xbf16>, vector<1x8x4xbf16>, vector<1x8x4xf32> -> vector<1x8x4xf32>
    "tpu.trace_stop"() : () -> ()
    %209 = vector.shape_cast %208 : vector<1x8x4xf32> to vector<8x4xf32>
    %210 = tpu.concatenate %48, %71, %94, %117, %140, %163, %186, %209 in 1 : vector<8x4xf32>, vector<8x4xf32>, vector<8x4xf32>, vector<8x4xf32>, vector<8x4xf32>, vector<8x4xf32>, vector<8x4xf32>, vector<8x4xf32> -> vector<8x32xf32>
    %211 = arith.truncf %210 : vector<8x32xf32> to vector<8x32xbf16>
    %c0_55 = arith.constant 0 : index
    %c0_56 = arith.constant 0 : index
    %212 = vector.load %arg7[%c0_55, %c0_56] : memref<32x32xbf16, #tpu.memory_space<vmem>>, vector<32x32xbf16>
    %cst_57 = arith.constant dense<0.000000e+00> : vector<8x32xf32>
    %213 = tpu.matmul %211, %212, %cst_57 {dimension_numbers = #tpu.dot_dimension_numbers<[1], [0], [0], [1], [0, 0, 1, 1], [], []>} : vector<8x32xbf16>, vector<32x32xbf16>, vector<8x32xf32> -> vector<8x32xf32>
    %c0_58 = arith.constant 0 : index
    %c0_59 = arith.constant 0 : index
    %214 = vector.load %arg11[%c0_58, %c0_59] : memref<1x32xf32, #tpu.memory_space<vmem>>, vector<1x32xf32>
    %215 = vector.broadcast %214 : vector<1x32xf32> to vector<8x32xf32>
    %216 = arith.addf %213, %215 : vector<8x32xf32>
    %217 = vector.shape_cast %216 : vector<8x32xf32> to vector<1x8x32xf32>
    %c0_60 = arith.constant 0 : index
    %c0_61 = arith.constant 0 : index
    %c0_62 = arith.constant 0 : index
    %218 = vector.load %arg12[%c0_60, %c0_61, %c0_62] : memref<1x8x32xf32, #tpu.memory_space<vmem>>, vector<1x8x32xf32>
    tpu.vector_store %arg12[%c0_60, %c0_61, %c0_62], %217 {strides = array<i32>} : memref<1x8x32xf32, #tpu.memory_space<vmem>>, vector<1x8x32xf32>,
    return
  }
  func.func @transform_0(%arg0: i32) -> (i32, i32, i32) {
    %c0_i32 = arith.constant 0 : i32
    %c0_i32_0 = arith.constant 0 : i32
    %c0_i32_1 = arith.constant 0 : i32
    return %arg0, %c0_i32, %c0_i32_0 : i32, i32, i32
  }
  func.func @transform_1(%arg0: i32) -> (i32, i32, i32) {
    %c0_i32 = arith.constant 0 : i32
    %c0_i32_0 = arith.constant 0 : i32
    %c0_i32_1 = arith.constant 0 : i32
    return %arg0, %c0_i32, %c0_i32_0 : i32, i32, i32
  }
  func.func @transform_2(%arg0: i32) -> (i32, i32, i32) {
    %c0_i32 = arith.constant 0 : i32
    %c0_i32_0 = arith.constant 0 : i32
    %c0_i32_1 = arith.constant 0 : i32
    return %arg0, %c0_i32, %c0_i32_0 : i32, i32, i32
  }
  func.func @transform_3(%arg0: i32) -> (i32, i32) {
    %c0_i32 = arith.constant 0 : i32
    %c0_i32_0 = arith.constant 0 : i32
    %c0_i32_1 = arith.constant 0 : i32
    return %c0_i32, %c0_i32_0 : i32, i32
  }
  func.func @transform_4(%arg0: i32) -> (i32, i32) {
    %c0_i32 = arith.constant 0 : i32
    %c0_i32_0 = arith.constant 0 : i32
    %c0_i32_1 = arith.constant 0 : i32
    return %c0_i32, %c0_i32_0 : i32, i32
  }
  func.func @transform_5(%arg0: i32) -> (i32, i32) {
    %c0_i32 = arith.constant 0 : i32
    %c0_i32_0 = arith.constant 0 : i32
    %c0_i32_1 = arith.constant 0 : i32
    return %c0_i32, %c0_i32_0 : i32, i32
  }
  func.func @transform_6(%arg0: i32) -> (i32, i32) {
    %c0_i32 = arith.constant 0 : i32
    %c0_i32_0 = arith.constant 0 : i32
    %c0_i32_1 = arith.constant 0 : i32
    return %c0_i32, %c0_i32_0 : i32, i32
  }
  func.func @transform_7(%arg0: i32) -> (i32, i32) {
    %c0_i32 = arith.constant 0 : i32
    %c0_i32_0 = arith.constant 0 : i32
    %c0_i32_1 = arith.constant 0 : i32
    return %c0_i32, %c0_i32_0 : i32, i32
  }
  func.func @transform_8(%arg0: i32) -> (i32, i32) {
    %c0_i32 = arith.constant 0 : i32
    %c0_i32_0 = arith.constant 0 : i32
    %c0_i32_1 = arith.constant 0 : i32
    return %c0_i32, %c0_i32_0 : i32, i32
  }
  func.func @transform_9(%arg0: i32) -> (i32, i32) {
    %c0_i32 = arith.constant 0 : i32
    %c0_i32_0 = arith.constant 0 : i32
    %c0_i32_1 = arith.constant 0 : i32
    return %c0_i32, %c0_i32_0 : i32, i32
  }
  func.func @transform_10(%arg0: i32) -> (i32, i32) {
    %c0_i32 = arith.constant 0 : i32
    %c0_i32_0 = arith.constant 0 : i32
    %c0_i32_1 = arith.constant 0 : i32
    return %c0_i32, %c0_i32_0 : i32, i32
  }
  func.func @transform_11(%arg0: i32) -> (i32, i32, i32) {
    %c0_i32 = arith.constant 0 : i32
    %c0_i32_0 = arith.constant 0 : i32
    %c0_i32_1 = arith.constant 0 : i32
    return %arg0, %c0_i32, %c0_i32_0 : i32, i32, i32
  }
}

</mosaic_0001>

<bundles_post_ra>
// kernel: tpu_custom_call.1
= control target key start
LH: loop header
LB: loop body
LE: loop exit
PB: predicated region body
PF: predicated region fallthrough
CT: control target
= control target key end

     0   :  { %s3116_s0 = inlined_call_operand.hbm [shape: f32[2,8,32], index: 0, kind: input, shape index: {}]   ;;  %s3117_s1 = inlined_call_operand.hbm [shape: f32[2,8,32], index: 1, kind: input, shape index: {}]   ;;  %s3118_s2 = inlined_call_operand.hbm [shape: f32[2,8,32], index: 2, kind: input, shape index: {}]   ;;  %s3119_s3 = inlined_call_operand.hbm [shape: bf16[32,32], index: 3, kind: input, shape index: {}]   ;;  %s3120_s4 = inlined_call_operand.hbm [shape: bf16[32,32], index: 4, kind: input, shape index: {}]   ;;  %s3121_s5 = inlined_call_operand.vmem [shape: bf16[32,32], index: 5, kind: input, shape index: {}]   ;;  %s3122_s6 = inlined_call_operand.hbm [shape: bf16[32,32], index: 6, kind: input, shape index: {}]   ;;  %s3123_s7 = inlined_call_operand.vmem [shape: f32[1,32], index: 7, kind: input, shape index: {}]   ;;  %s3124_s8 = inlined_call_operand.vmem [shape: f32[1,32], index: 8, kind: input, shape index: {}]   ;;  %s3125_s9 = inlined_call_operand.vmem [shape: f32[1,32], index: 9, kind: input, shape index: {}]   ;;  %s3126_s10 = inlined_call_operand.vmem [shape: f32[1,32], index: 10, kind: input, shape index: {}]   ;;  %s3127_s11 = inlined_call_operand.hbm [shape: f32[2,8,32], index: 11, kind: output, shape index: {}]  }
   0x1   :  { %3154 = sst [smem:[#allocation25_spill]] %s3117_s1 }
   0x2   :  { %3155 = sst [smem:[#allocation26_spill]] %s3119_s3 }
   0x3   :  { %3156 = sst [smem:[#allocation27_spill]] %s3121_s5 }
   0x4   :  { %3157 = sst [smem:[#allocation28_spill]] %s3125_s9 }
   0x5   :  { %3158 = sst [smem:[#allocation29_spill]] %s3126_s10 }
   0x6   :  { %3159 = sst [smem:[#allocation30_spill]] %s3127_s11 }
   0x7   :  { %16 = vsyncpa [#allocation3], 0 }
   0x8   :  { %18 = vsyncpa [#allocation3 + $0x1], 0 }
   0x9   :  { %19 = vsyncpa [#allocation6], 0 }
   0xa   :  { %21 = vsyncpa [#allocation6 + $0x1], 0 }
   0xb   :  { %22 = vsyncpa [#allocation9], 0 }
   0xc   :  { %23 = vsyncpa [#allocation12], 0 }
   0xd   :  { %24 = vsyncpa [#allocation4], 0 }
   0xe   :  { %26 = vsyncpa [#allocation4 + $0x1], 0  ;;  %s2583_s17 = smov 0   ;;  %s2585_s18 = smov 0  }
   0xf   :  { %s2587_s19 = smov 0   ;;  %s2589_s20 = smov 0  }
  0x10 LB: > { %3160 = sst [smem:[#allocation19_spill]] %s2484_s17  ;;  %s2604_s21 = sadd.s32 4294967295, %s2496_s20   ;;  %s2496_s20 = sphi %s2589_s20, %s3202_s20   ;;  %s2492_s19 = sphi %s2587_s19, %s3206_s19   ;;  %s2488_s18 = sphi %s2585_s18, %s3205_s18   ;;  %s2484_s17 = sphi %s2583_s17, %s3204_s17  }
  0x11   : > { %3161 = sst [smem:[#allocation20_spill]] %s2496_s20  ;;  %s1871_s22 = sadd.s32 4294967294, %s2496_s20  }
  0x12   : > { %p52_p0 = scmp.ne.s32.totalorder %s2488_s18, %s2484_s17  ;;  %p3130_p1 = scmp.eq.s32.totalorder %s2604_s21, 0 }
  0x13   : > { %p302_p3 = scmp.eq.s32.totalorder %s1871_s22, 1  ;;  %p1872_p5 = scmp.ge.s32.totalorder %s2496_s20, 1 }
  0x14   : > { %p2613_p4 = por %p3130_p1, %p52_p0  ;;  %p309_p7 = scmp.lt.s32.totalorder %s2496_s20, 3 }
  0x15   : > { %p2618_p6 = por %p302_p3, %p52_p0  ;;  %s2498_s26 = smov [#allocation8]  }
  0x16   : > { %s3162_s23 = scalar_select %p2613_p4, 1, 0 }
  0x17   : > { %s3163_s24 = scalar_select %p2618_p6, 1, 0 }
  0x18   : > { %p2623_p8 = pnand %p1872_p5, %p309_p7  ;;  %s321_s27 = sshll.u32 %s2498_s26, 4  ;;  %s2627_s27 = int_to_ptr.vmem [resolvable:$true] %s321_s27 }
  0x19   : > { %3164 = sst [smem:[#allocation21_spill]] %s3163_s24  ;;  %s2639_s29 = sadd.s32 1, %s2496_s20  }
  0x1a   : > { %s3165_s25 = scalar_select %p2623_p8, 1, 0 }
  0x1b   : > { %p2119_p9 = pneg %p2623_p8  ;;  %3167 = sst [smem:[#allocation22_spill]] %s2639_s29 }
  0x1c   : > { %s39_s30 = sadd.s32 1, %s2492_s19  ;;  %s36_s12 = ssub.s32 %s2496_s20, %s2639_s29 }
  0x1d   : > { %p2634_p11 = pnand %p2119_p9, %p3130_p1  ;;  %s3168_s3 = sld [smem:[#allocation26_spill]] }
  0x1f   : > { %s3166_s28 = scalar_select %p2634_p11, 1, 0 }
  0x20   : > { %p2652_p13 = pneg %p2634_p11 }
  0x22   : > { %s3169_s26 = scalar_select %p2652_p13, 1, 0 }
  0x23   : > { %s2244_s15 = scalar_lea.hbm %s3168_s3, 256 }
  0x24   : > { %p2245_p12 = scmp.ne.s32.totalorder %s3168_s3, %s2244_s15  ;;  %p2251_p5 = scmp.lt.u32.totalorder %s2244_s15, %s3168_s3 }
  0x26   : > { %p2247_p0 = pnand %p2652_p13, %p2245_p12 }
  0x28   : > { %p2248_p3 = pneg %p2247_p0 }
  0x2a   : > { %p2253_p7 = pnand %p2251_p5, %p2248_p3 }
  0x2c   : > { %2256 = shalt.err (!%p2253_p7)
}
  0x2d   : > { %s2257_s13 = scalar_lea.vmem %s2627_s27, 256  ;;  %p2265_p2 = scmp.lt.s32.totalorder %s2627_s27, %s2627_s27 }
  0x2e   : > { %p2258_p9 = scmp.ne.s32.totalorder %s2627_s27, %s2257_s13  ;;  %p2266_p6 = scmp.lt.s32.totalorder %s2257_s13, %s2257_s13 }
  0x30   : > { %p2260_p10 = pnand %p2258_p9, %p2652_p13  ;;  %p2267_p12 = por %p2266_p6, %p2265_p2 }
  0x32   : > { %p2261_p1 = pneg %p2260_p10 }
  0x34   : > { %p2268_p0 = pnand %p2267_p12, %p2261_p1 }
  0x36   : > { %2271 = shalt.err (!%p2268_p0)
}
  0x37   : > { %s3134_s14 = smov 64   ;;  %s3136_s17 = smov 4  }
  0x38   : > { %2122 = dma.hbm_to_vmem [thread:$0]  (!%p2634_p11), %s3168_s3, 256, %s2627_s27, [#allocation9], %s3134_s14, %s3134_s14, %s3136_s17  }
  0x39   : > { %p37_p1 = scmp.eq.s32.totalorder %s36_s12, 0  ;;  %p46_p2 = scmp.ne.s32.totalorder %s2492_s19, %s2488_s18 }
  0x3a   : > { %p47_p6 = scmp.eq.s32.totalorder %s2496_s20, 0  ;;  %p2146_p10 = scmp.lt.s32.totalorder %s2496_s20, 2 }
  0x3b   : > { %s2681_s16 = scalar_select %p37_p1, %s2492_s19, %s39_s30  }
  0x3c   : > { %p48_p3 = por %p47_p6, %p46_p2  ;;  %p3171_p5 = scmp.eq.s32.totalorder %s2604_s21, 1 }
  0x3d   : > { %3170 = sst [smem:[#allocation23_spill]] %s2681_s16  ;;  %s3138_s13 = sand.u32 1, %s2492_s19  }
  0x3e   : > { %p2685_p7 = por %p3171_p5, %p46_p2  ;;  %s2691_s29 = sshll.u32 %s2496_s20, 7 }
  0x3f   : > { %s2695_s11 = sshll.u32 %s3138_s13, 3  ;;  %p2697_p9 = pnand %p2146_p10, %p48_p3 }
  0x40   : > { %s3172_s22 = scalar_select %p2685_p7, 1, 0 }
  0x41   : > { %s3174_s27 = scalar_select %p2697_p9, 1, 0 }
  0x42   : > { %3173 = sst [smem:[#allocation24_spill]] %s3172_s22  ;;  %s394_s30 = sand.u32 1, %s2496_s20  }
  0x43   : > { %s3175_s1 = sld [smem:[#allocation25_spill]]  ;;  %s398_s14 = scalar_lea.vmem [#allocation5], %s2695_s11 }
  0x44   : > { %s405_s17 = sshll.u32 %s398_s14, 4  ;;  %s2711_s13 = scalar_lea.sflag [#allocation6], %s394_s30  ;;  %s2709_s17 = int_to_ptr.vmem [resolvable:$true] %s405_s17 }
  0x45   : > { %p2717_p0 = pneg %p2697_p9 }
  0x47   : > { %s3176_s16 = scalar_select %p2717_p0, 1, 0 }
  0x49   : > { %s2706_s15 = scalar_lea.hbm %s3175_s1, %s2691_s29  ;;  %s2277_s20 = scalar_lea.hbm %s3175_s1, 256 }
  0x4a   : > { %s2272_s3 = scalar_lea.hbm %s2706_s15, 128  ;;  %p2278_p6 = scmp.lt.u32.totalorder %s2706_s15, %s3175_s1 }
  0x4b   : > { %p2273_p12 = scmp.ne.s32.totalorder %s2706_s15, %s2272_s3  ;;  %p2279_p10 = scmp.lt.u32.totalorder %s2277_s20, %s2272_s3 }
  0x4c   : > { %p2281_p5 = scmp.lt.u32.totalorder %s2272_s3, %s2706_s15 }
  0x4d   : > { %p2275_p1 = pnand %p2717_p0, %p2273_p12  ;;  %p2280_p3 = por %p2279_p10, %p2278_p6 }
  0x4f   : > { %p2276_p2 = pneg %p2275_p1  ;;  %p2282_p7 = por %p2281_p5, %p2280_p3 }
  0x51   : > { %p2283_p4 = pnand %p2282_p7, %p2276_p2 }
  0x53   : > { %2286 = shalt.err (!%p2283_p4)
}
  0x54   : > { %s2287_s30 = scalar_lea.vmem %s2709_s17, 128  ;;  %s2501_s12 = smov [#allocation5]  }
  0x55   : > { %p2288_p12 = scmp.ne.s32.totalorder %s2709_s17, %s2287_s30  ;;  %s2292_s24 = sshll.u32 %s2501_s12, 4  ;;  %s2293_s24 = int_to_ptr.vmem [resolvable:$false] %s2292_s24 }
  0x56   : > { %s2294_s22 = scalar_lea.vmem %s2293_s24, 256  ;;  %p2295_p11 = scmp.lt.s32.totalorder %s2709_s17, %s2293_s24 }
  0x57   : > { %p2290_p1 = pnand %p2288_p12, %p2717_p0  ;;  %p2296_p13 = scmp.lt.s32.totalorder %s2294_s22, %s2287_s30 }
  0x59   : > { %p2291_p8 = pneg %p2290_p1  ;;  %p2297_p6 = por %p2296_p13, %p2295_p11 }
  0x5b   : > { %p2298_p10 = pnand %p2297_p6, %p2291_p8 }
  0x5d   : > { %2301 = shalt.err (!%p2298_p10)
}
  0x5e   : > { %2135 = dma.hbm_to_vmem [thread:$0]  (!%p2697_p9), %s2706_s15, 128, %s2709_s17, %s2711_s13  }
  0x5f   : > { %s2502_s3 = smov [#allocation10]   ;;  %s2503_s14 = smov [#allocation11]  }
  0x60   : > { %s334_s20 = sshll.u32 %s2502_s3, 4  ;;  %s350_s1 = sshll.u32 %s2503_s14, 4  ;;  %s335_s20 = int_to_ptr.vmem [resolvable:$true] %s334_s20  ;;  %s351_s1 = int_to_ptr.vmem [resolvable:$true] %s350_s1 }
  0x61   : > { %s2302_s24 = scalar_lea.hbm %s3120_s4, 256  ;;  %p3177_p8 = scmp.ne.s32.totalorder %s3169_s26, 0 }
  0x62   : > { %p2303_p4 = scmp.ne.s32.totalorder %s3120_s4, %s2302_s24  ;;  %p2309_p7 = scmp.lt.u32.totalorder %s2302_s24, %s3120_s4 }
  0x64   : > { %p2305_p11 = pnand %p2303_p4, %p3177_p8 }
  0x66   : > { %p2306_p13 = pneg %p2305_p11 }
  0x68   : > { %p2311_p2 = pnand %p2309_p7, %p2306_p13 }
  0x6a   : > { %2314 = shalt.err (!%p2311_p2)
}
  0x6b   : > { %s2315_s17 = scalar_lea.vmem %s335_s20, 256  ;;  %p2323_p1 = scmp.lt.s32.totalorder %s335_s20, %s335_s20 }
  0x6c   : > { %p2316_p3 = scmp.ne.s32.totalorder %s335_s20, %s2315_s17  ;;  %p2324_p6 = scmp.lt.s32.totalorder %s2315_s17, %s2315_s17 }
  0x6e   : > { %p2318_p5 = pnand %p2316_p3, %p3177_p8  ;;  %p2325_p10 = por %p2324_p6, %p2323_p1 }
  0x70   : > { %p2319_p12 = pneg %p2318_p5 }
  0x72   : > { %p2326_p9 = pnand %p2325_p10, %p2319_p12 }
  0x74   : > { %2329 = shalt.err (!%p2326_p9)
}
  0x75   : > { %p3178_p4 = scmp.ne.s32.totalorder %s3166_s28, 0  ;;  %s3179_s10 = smov 4  }
  0x76   : > { %s3180_s15 = smov 64   ;;  %s2330_s12 = scalar_lea.hbm %s3122_s6, 256 }
  0x77   : > { %2125 = dma.hbm_to_vmem [thread:$0]  (!%p3178_p4), %s3120_s4, 256, %s335_s20, [#allocation9], %s3180_s15, %s3180_s15, %s3179_s10  }
  0x78   : > { %p2331_p11 = scmp.ne.s32.totalorder %s3122_s6, %s2330_s12  ;;  %p2337_p7 = scmp.lt.u32.totalorder %s2330_s12, %s3122_s6 }
  0x7a   : > { %p2333_p9 = pnand %p2331_p11, %p3177_p8 }
  0x7c   : > { %p2334_p13 = pneg %p2333_p9 }
  0x7e   : > { %p2339_p2 = pnand %p2337_p7, %p2334_p13 }
  0x80   : > { %2342 = shalt.err (!%p2339_p2)
}
  0x81   : > { %s2343_s5 = scalar_lea.vmem %s351_s1, 256  ;;  %p2351_p1 = scmp.lt.s32.totalorder %s351_s1, %s351_s1 }
  0x82   : > { %p2344_p3 = scmp.ne.s32.totalorder %s351_s1, %s2343_s5  ;;  %p2352_p6 = scmp.lt.s32.totalorder %s2343_s5, %s2343_s5 }
  0x84   : > { %p2346_p5 = pnand %p2344_p3, %p3177_p8  ;;  %p2353_p10 = por %p2352_p6, %p2351_p1 }
  0x86   : > { %p2347_p12 = pneg %p2346_p5 }
  0x88   : > { %p2354_p0 = pnand %p2353_p10, %p2347_p12 }
  0x8a   : > { %2357 = shalt.err (!%p2354_p0)
}
  0x8b   : > { %2128 = dma.hbm_to_vmem [thread:$0]  (!%p3178_p4), %s3122_s6, 256, %s351_s1, [#allocation12], %s3180_s15, %s3180_s15, %s3179_s10  }
  0x8c   : > { %s2787_s14 = scalar_lea.hbm %s3116_s0, %s2691_s29  ;;  %s380_s28 = scalar_lea.vmem [#allocation2], %s2695_s11 }
  0x8d   : > { %s387_s12 = sshll.u32 %s380_s28, 4  ;;  %s2796_s22 = scalar_lea.hbm %s3118_s2, %s2691_s29  ;;  %s2790_s12 = int_to_ptr.vmem [resolvable:$true] %s387_s12 }
  0x8e   : > { %s3181_s17 = sand.u32 1, %s2492_s19   ;;  %s2358_s10 = scalar_lea.hbm %s2787_s14, 128 }
  0x8f   : > { %s377_s1 = scalar_lea.sflag [#allocation3], %s3181_s17  ;;  %p2359_p0 = scmp.ne.s32.totalorder %s2787_s14, %s2358_s10 }
  0x90   : > { %p3182_p8 = scmp.ne.s32.totalorder %s3176_s16, 0  ;;  %s2363_s20 = scalar_lea.hbm %s3116_s0, 256 }
  0x91   : > { %p2364_p9 = scmp.lt.u32.totalorder %s2787_s14, %s3116_s0  ;;  %p2365_p13 = scmp.lt.u32.totalorder %s2363_s20, %s2358_s10 }
  0x92   : > { %p2361_p4 = pnand %p2359_p0, %p3182_p8  ;;  %p2367_p2 = scmp.lt.u32.totalorder %s2358_s10, %s2787_s14 }
  0x93   : > { %p2366_p7 = por %p2365_p13, %p2364_p9 }
  0x94   : > { %p2362_p11 = pneg %p2361_p4 }
  0x95   : > { %p2368_p3 = por %p2367_p2, %p2366_p7 }
  0x97   : > { %p2369_p5 = pnand %p2368_p3, %p2362_p11 }
  0x99   : > { %2372 = shalt.err (!%p2369_p5)
}
  0x9a   : > { %s2373_s29 = scalar_lea.vmem %s2790_s12, 128  ;;  %s2504_s3 = smov [#allocation2]  }
  0x9b   : > { %p2374_p12 = scmp.ne.s32.totalorder %s2790_s12, %s2373_s29  ;;  %s2378_s28 = sshll.u32 %s2504_s3, 4  ;;  %s2379_s28 = int_to_ptr.vmem [resolvable:$false] %s2378_s28 }
  0x9c   : > { %s2380_s24 = scalar_lea.vmem %s2379_s28, 256  ;;  %p2381_p10 = scmp.lt.s32.totalorder %s2790_s12, %s2379_s28 }
  0x9d   : > { %p2376_p1 = pnand %p2374_p12, %p3182_p8  ;;  %p2382_p0 = scmp.lt.s32.totalorder %s2380_s24, %s2373_s29 }
  0x9f   : > { %p2377_p6 = pneg %p2376_p1  ;;  %p2383_p4 = por %p2382_p0, %p2381_p10 }
  0xa1   : > { %p2384_p9 = pnand %p2383_p4, %p2377_p6 }
  0xa3   : > { %2387 = shalt.err (!%p2384_p9)
}
  0xa4   : > { %p3183_p11 = scmp.ne.s32.totalorder %s3174_s27, 0  ;;  %s416_s30 = scalar_lea.vmem [#allocation7], %s2695_s11 }
  0xa5   : > { %s423_s17 = sshll.u32 %s416_s30, 4  ;;  %s2388_s10 = scalar_lea.hbm %s2796_s22, 128  ;;  %s424_s17 = int_to_ptr.vmem [resolvable:$true] %s423_s17 }
  0xa6   : > { %2132 = dma.hbm_to_vmem [thread:$0]  (!%p3183_p11), %s2787_s14, 128, %s2790_s12, %s377_s1  }
  0xa7   : > { %p2389_p13 = scmp.ne.s32.totalorder %s2796_s22, %s2388_s10  ;;  %s2393_s20 = scalar_lea.hbm %s3118_s2, 256 }
  0xa8   : > { %p2394_p3 = scmp.lt.u32.totalorder %s2796_s22, %s3118_s2  ;;  %p2395_p5 = scmp.lt.u32.totalorder %s2393_s20, %s2388_s10 }
  0xa9   : > { %p2391_p7 = pnand %p2389_p13, %p3182_p8  ;;  %p2397_p1 = scmp.lt.u32.totalorder %s2388_s10, %s2796_s22 }
  0xaa   : > { %p2396_p12 = por %p2395_p5, %p2394_p3 }
  0xab   : > { %p2392_p2 = pneg %p2391_p7 }
  0xac   : > { %p2398_p6 = por %p2397_p1, %p2396_p12 }
  0xae   : > { %p2399_p10 = pnand %p2398_p6, %p2392_p2 }
  0xb0   : > { %2402 = shalt.err (!%p2399_p10)
}
  0xb1   : > { %s2403_s11 = scalar_lea.vmem %s424_s17, 128  ;;  %s2505_s14 = smov [#allocation7]  }
  0xb2   : > { %p2404_p0 = scmp.ne.s32.totalorder %s424_s17, %s2403_s11  ;;  %s2408_s12 = sshll.u32 %s2505_s14, 4  ;;  %s2409_s12 = int_to_ptr.vmem [resolvable:$false] %s2408_s12 }
  0xb3   : > { %s2410_s1 = scalar_lea.vmem %s2409_s12, 256  ;;  %p2411_p13 = scmp.lt.s32.totalorder %s424_s17, %s2409_s12 }
  0xb4   : > { %p2406_p4 = pnand %p2404_p0, %p3182_p8  ;;  %p2412_p7 = scmp.lt.s32.totalorder %s2410_s1, %s2403_s11 }
  0xb6   : > { %p2407_p9 = pneg %p2406_p4  ;;  %p2413_p11 = por %p2412_p7, %p2411_p13 }
  0xb8   : > { %p2414_p3 = pnand %p2413_p11, %p2407_p9 }
  0xba   : > { %2417 = shalt.err (!%p2414_p3)
}
  0xbb   : > { %p3184_p5 = scmp.ne.s32.totalorder %s3174_s27, 0  ;;  %p3185_p2 = scmp.ne.s32.totalorder %s3165_s25, 0 }
  0xbc   : > { %s2843_s16 = sand.u32 (!%p3185_p2), 1, %s2488_s18   ;;  %p3186_p8 = scmp.ne.s32.totalorder (!%p3185_p2), %s3162_s23, 0 }
  0xbd   : > { %2138 = dma.hbm_to_vmem [thread:$0]  (!%p3184_p5), %s2796_s22, 128, %s424_s17, %s2711_s13  }
  0xbe   : > { %432 = sbr.rel (%p3185_p2) target bundleno = 1727 (0x6bf), region = 64  ;;  %s2846_s29 = sshll.u32 (!%p3185_p2), %s2843_s16, 3 }
  0xbf   : > { %s435_s3 = scalar_lea.sflag (!%p3185_p2), [#allocation3], %s2843_s16  ;;  %s438_s28 = scalar_lea.vmem (!%p3185_p2), [#allocation2], %s2846_s29 }
  0xc5   : > { %2463 = dma.done.wait (%p3186_p8), %s435_s3, 128  }
  0xc6   : > { %2465 = vsyncadd (%p3186_p8), %s435_s3, 4294967168  ;;  %s443_s25 = sand.u32 1, %s2604_s21   ;;  %s447_s27 = scalar_lea.vmem [#allocation5], %s2846_s29 }
  0xc7   : > { %s444_s13 = scalar_lea.sflag [#allocation6], %s443_s25 }
  0xc8   : > { %2467 = dma.done.wait (%p3186_p8), %s444_s13, 256  }
  0xc9   : > { %2469 = vsyncadd (%p3186_p8), %s444_s13, 4294967040  ;;  %s456_s22 = scalar_lea.vmem [#allocation7], %s2846_s29  ;;  %p3187_p11 = scmp.eq.s32.totalorder %s2604_s21, 0 }
  0xcb   : > { %2471 = dma.done.wait (%p3187_p11), [#allocation9], 512   ;;  %p3188_p12 = pmov %p3187_p11 }
  0xcc   : > { %p3189_p1 = pmov %p3187_p11 }
  0xcd   : > { %2473 = vsyncadd (%p3188_p12), [#allocation9], 4294966784 }
  0xce   : > { %2475 = dma.done.wait (%p3189_p1), [#allocation12], 256   ;;  %p3190_p6 = pmov %p3189_p1 }
  0xcf   : > { %v2506_v0 = vmov 0.0   ;;  %vm2507_vm0 = vmmov 0   ;;  %v2204_v1 = vld [vmem:[#allocation10] sm:$0xff]   ;;  %v2205_v2 = vld [vmem:[#allocation8] sm:$0xff]   ;;  %v2206_v3 = vld [vmem:[#allocation10 + $0x8] sm:$0xff]   ;;  %vm543_vm1 = vcmask 261120  }
  0xd0   : > { %2477 = vsyncadd (%p3190_p6), [#allocation12], 4294967040  ;;  %1979 = vmatprep.subr.bf16.mxu1 %v2506_v0  ;;  %1971 = vmatprep.subr.bf16.mxu0 %v2506_v0  ;;  %v2207_v4 = vld [vmem:[#allocation8 + $0x8] sm:$0xff]   ;;  %v518_v6 = vld [vmem:[%s438_s28] sm:$0xff]  ;;  %vm727_vm2 = vcmask 31744   ;;  %s2508_s10 = smov 120  }
  0xd1   : > { %1983 = vmatprep.mubr.msk.bf16.mxu1 %vm2507_vm0, %v2506_v0  ;;  %1975 = vmatprep.mubr.msk.bf16.mxu0 %vm2507_vm0, %v2506_v0  ;;  %v588_v5 = vld [vmem:[%s447_s27] sm:$0xff]  ;;  %v519_v8 = vpack.c.bf16 %v518_v6, %v518_v6  ;;  %v1895_v9 = vld [vmem:[%s3124_s8] ss:$0 sm:$0xff]  ;;  %s2509_s15 = smov 124   ;;  %s2510_s5 = smov 116   ;;  %vm774_vm3 = vcmask 64512  }
  0xd2   : > { %1980 = vmatpush3.bf16.msra.mxu1 %v2204_v1  ;;  %1972 = vmatpush3.bf16.msra.mxu0 %v2205_v2  ;;  %v589_v7 = vpack.c.bf16 %v588_v5, %v588_v5  ;;  %v1891_v10 = vld [vmem:[%s3123_s7] ss:$0 sm:$0xff]  ;;  %s2511_s20 = smov 112   ;;  %s2512_s9 = smov 108   ;;  %vm790_vm4 = vcmask 1043456   ;;  %vm1637_vm5 = vcmask 97280  }
  0xd3   : > { %1981 = vmatprep.subr.bf16.mxu1 %v2506_v0  ;;  %1973 = vmatprep.subr.bf16.mxu0 %v2506_v0  ;;  %s2513_s26 = smov 104   ;;  %s2514_s11 = smov 100   ;;  %v656_v27 = vld [vmem:[%s456_s22] sm:$0xff]  ;;  %vm1639_vm6 = vcmask 130048   ;;  %vm1641_vm7 = vcmask 162816   ;;  %vm1643_vm8 = vcmask 195584  }
  0xd4   : > { %s3191_s1 = sld [smem:[#allocation27_spill]]  ;;  %v657_v28 = vpack.c.bf16 %v656_v27, %v656_v27  ;;  %s3192_s27 = sld [smem:[#allocation28_spill]]  ;;  %vm1645_vm9 = vcmask 228352  }
  0xd5   : > { %s2515_s22 = smov 4   ;;  %s2516_s23 = smov 8  }
  0xd6   : > { %1982 = vmatpush3.bf16.msra.mxu1 %v2206_v3  ;;  %1974 = vmatpush3.bf16.msra.mxu0 %v2207_v4  ;;  %s2517_s24 = smov 12   ;;  %s2518_s30 = smov 16  }
  0xd7   : > { %1995 = vmatprep.subr.bf16.mxu1 %v2506_v0  ;;  %1987 = vmatprep.subr.bf16.mxu0 %v2506_v0  ;;  %s2519_s17 = smov 20   ;;  %s516_s14 = scalar_lea.vmem [#allocation13], %s2846_s29 }
  0xd8   : > { %s1729_s12 = sshll.u32 %s516_s14, 4  ;;  %s3195_s25 = sld [smem:[#allocation30_spill]]  ;;  %s3073_s12 = int_to_ptr.vmem [resolvable:$true] %s1729_s12 }
  0xd9   : > { %1984 = vmatmul.mubr.msk.bf16.vlgmr.msra.gmra.mrb[0].mxu1 %vm543_vm1, %v589_v7  ;;  %1976 = vmatmul.mubr.msk.bf16.vlgmr.msra.gmra.mrb[0].mxu0 %vm543_vm1, %v519_v8  ;;  %s2418_s29 = scalar_lea.vmem %s3073_s12, 128 }
  0xda   : > { %1997 = vmatprep.mubr.msk.bf16.mxu1 %vm2507_vm0, %v2506_v0  ;;  %1991 = vmatprep.mubr.msk.bf16.mxu0 %vm2507_vm0, %v2506_v0  ;;  %v2208_v25 = vld [vmem:[%s3191_s1] sm:$0xff]   ;;  %v2209_v26 = vld [vmem:[%s3191_s1 + $0x8] sm:$0xff]   ;;  %p2419_p10 = scmp.ne.s32.totalorder %s3073_s12, %s2418_s29 }
  0xdb   : > { %1988 = vmatpush3.bf16.msra.mxu0 %v2208_v25  ;;  %v1899_v55 = vld [vmem:[%s3192_s27] ss:$0 sm:$0xff]  ;;  %s2522_s27 = smov [#allocation13]  }
  0xdc   : > { %1989 = vmatprep.subr.bf16.mxu0 %v2506_v0 }
  0xdf   : > { %1990 = vmatpush3.bf16.msra.mxu0 %v2209_v26 }
  0xe0   : > { %2001 = vmatprep.subr.bf16.mxu0 %v2506_v0 }
  0xe2   : > { %1992 = vmatmul.mubr.msk.bf16.vlgmr.msra.gmra.mrb[4].mxu0 %vm543_vm1, %v657_v28 }
  0xe3   : > { %2003 = vmatprep.mubr.msk.bf16.mxu0 %vm2507_vm0, %v2506_v0 }
 0x1ac   : > { %v650_v11 = vpop.f32.mrb[0].mxu1  ;;  %v581_v14 = vpop.f32.mrb[0].mxu0 }
 0x1ad   : > { %v651_v12 = vadd.f32 %v1895_v9, %v650_v11  ;;  %v1985_v13 = vpop.f32.mrb[1].mxu1  ;;  %v582_v15 = vadd.f32 %v1891_v10, %v581_v14  ;;  %v1977_v17 = vpop.f32.mrb[1].mxu0 }
 0x1ae   : > { %v653_v16 = vpop.f32.mrb[2].mxu1  ;;  %v584_v20 = vpop.f32.mrb[2].mxu0 }
 0x1af   : > { %v725_v18 = vpack.c.bf16 %v651_v12, %v651_v12  ;;  %v1986_v19 = vpop.f32.mrb[3].mxu1  ;;  %v587_v21 = vmul.f32 0.5, %v582_v15  ;;  %v1978_v22 = vpop.f32.mrb[3].mxu0 }
 0x1b1   : > { %949 = vrot.lane.b32.xlu1 %v725_v18, %s2508_s10  ;;  %838 = vrot.lane.b32.xlu0 %v725_v18, %s2509_s15  ;;  %v732_v23 = vsel %vm727_vm2, %v725_v18, 0  ;;  %v724_v24 = vpack.c.bf16 %v587_v21, %v587_v21 }
 0x1b2   : > { %1996 = vmatpush3.bf16.xpose.msra.mxu1 %v732_v23 }
 0x1b3   : > { %2007 = vmatprep.subr.bf16.mxu1 %v2506_v0 }
 0x1b5   : > { %947 = vrot.lane.b32.xlu1 %v724_v24, %s2508_s10  ;;  %835 = vrot.lane.b32.xlu0 %v724_v24, %s2509_s15  ;;  %v718_v56 = vpop.f32.mrb[4].mxu0 }
 0x1b6   : > { %v719_v57 = vadd.f32 %v1899_v55, %v718_v56  ;;  %v1993_v58 = vpop.f32.mrb[5].mxu0 }
 0x1b7   : > { %v721_v59 = vpop.f32.mrb[6].mxu0 }
 0x1b8   : > { %v2962_v60 = vpack.c.bf16 %v719_v57, %v719_v57  ;;  %v1994_v61 = vpop.f32.mrb[7].mxu0 }
 0x1b9   : > { %1057 = vrot.lane.b32.xlu1 %v724_v24, %s2510_s5  ;;  %1059 = vrot.lane.b32.xlu0 %v725_v18, %s2510_s5 }
 0x1ba   : > { %1998 = vmatmul.mubr.msk.bf16.vlgmr.msra.gmra.mrb[4].mxu1 %vm727_vm2, %v724_v24  ;;  %v792_v62 = vsel %vm790_vm4, %v2962_v60, 0 }
 0x1bb   : > { %2009 = vmatprep.mubr.msk.bf16.mxu1 %vm2507_vm0, %v2506_v0  ;;  %2002 = vmatpush3.bf16.msra.mxu0 %v792_v62 }
 0x1bc   : > { %2013 = vmatprep.subr.bf16.mxu0 %v2506_v0 }
 0x1bd   : > { %1167 = vrot.lane.b32.xlu1 %v724_v24, %s2511_s20  ;;  %1169 = vrot.lane.b32.xlu0 %v725_v18, %s2511_s20 }
 0x1c1   : > { %1277 = vrot.lane.b32.xlu1 %v724_v24, %s2512_s9  ;;  %1279 = vrot.lane.b32.xlu0 %v725_v18, %s2512_s9 }
 0x1c5   : > { %1387 = vrot.lane.b32.xlu1 %v724_v24, %s2513_s26  ;;  %1389 = vrot.lane.b32.xlu0 %v725_v18, %s2513_s26 }
 0x1c9   : > { %1497 = vrot.lane.b32.xlu1 %v724_v24, %s2514_s11  ;;  %1499 = vrot.lane.b32.xlu0 %v725_v18, %s2514_s11 }
 0x223   : > { %v839_v29 = vpop.permute.xlu0 %838  ;;  %v950_v31 = vpop.permute.xlu1 %949 }
 0x224   : > { %v844_v30 = vsel %vm727_vm2, %v839_v29, 0  ;;  %v955_v33 = vsel %vm727_vm2, %v950_v31, 0 }
 0x225   : > { %2008 = vmatpush3.bf16.xpose.msra.mxu1 %v844_v30 }
 0x226   : > { %2019 = vmatprep.subr.bf16.mxu1 %v2506_v0 }
 0x227   : > { %v836_v32 = vpop.permute.xlu0 %835  ;;  %v948_v35 = vpop.permute.xlu1 %947 }
 0x22b   : > { %v1060_v34 = vpop.permute.xlu0 %1059  ;;  %v1058_v38 = vpop.permute.xlu1 %1057 }
 0x22c   : > { %2010 = vmatmul.mubr.msk.bf16.vlgmr.msra.gmra.mrb[8].mxu1 %vm727_vm2, %v836_v32  ;;  %v1065_v36 = vsel %vm727_vm2, %v1060_v34, 0 }
 0x22d   : > { %2020 = vmatpush3.bf16.xpose.msra.mxu1 %v955_v33  ;;  %2021 = vmatprep.mubr.msk.bf16.mxu1 %vm2507_vm0, %v2506_v0 }
 0x22e   : > { %2031 = vmatprep.subr.bf16.mxu1 %v2506_v0 }
 0x22f   : > { %v1170_v37 = vpop.permute.xlu0 %1169  ;;  %v1168_v41 = vpop.permute.xlu1 %1167 }
 0x230   : > { %v1175_v39 = vsel %vm727_vm2, %v1170_v37, 0 }
 0x233   : > { %v1280_v40 = vpop.permute.xlu0 %1279  ;;  %v1278_v44 = vpop.permute.xlu1 %1277 }
 0x234   : > { %2022 = vmatmul.mubr.msk.bf16.vlgmr.msra.gmra.mrb[12].mxu1 %vm727_vm2, %v948_v35  ;;  %v1285_v42 = vsel %vm727_vm2, %v1280_v40, 0 }
 0x235   : > { %2032 = vmatpush3.bf16.xpose.msra.mxu1 %v1065_v36  ;;  %2033 = vmatprep.mubr.msk.bf16.mxu1 %vm2507_vm0, %v2506_v0 }
 0x236   : > { %2043 = vmatprep.subr.bf16.mxu1 %v2506_v0 }
 0x237   : > { %v1390_v43 = vpop.permute.xlu0 %1389  ;;  %v1388_v47 = vpop.permute.xlu1 %1387 }
 0x238   : > { %v1395_v45 = vsel %vm727_vm2, %v1390_v43, 0 }
 0x23b   : > { %v1500_v46 = vpop.permute.xlu0 %1499  ;;  %v1498_v49 = vpop.permute.xlu1 %1497 }
 0x23c   : > { %2034 = vmatmul.mubr.msk.bf16.vlgmr.msra.gmra.mrb[16].mxu1 %vm727_vm2, %v1058_v38  ;;  %v1505_v48 = vsel %vm727_vm2, %v1500_v46, 0 }
 0x23d   : > { %2044 = vmatpush3.bf16.xpose.msra.mxu1 %v1175_v39  ;;  %2045 = vmatprep.mubr.msk.bf16.mxu1 %vm2507_vm0, %v2506_v0 }
 0x23e   : > { %2055 = vmatprep.subr.bf16.mxu1 %v2506_v0 }
 0x244   : > { %2046 = vmatmul.mubr.msk.bf16.vlgmr.msra.gmra.mrb[20].mxu1 %vm727_vm2, %v1168_v41 }
 0x245   : > { %2056 = vmatpush3.bf16.xpose.msra.mxu1 %v1285_v42  ;;  %2057 = vmatprep.mubr.msk.bf16.mxu1 %vm2507_vm0, %v2506_v0 }
 0x246   : > { %2067 = vmatprep.subr.bf16.mxu1 %v2506_v0 }
 0x24c   : > { %2058 = vmatmul.mubr.msk.bf16.vlgmr.msra.gmra.mrb[24].mxu1 %vm727_vm2, %v1278_v44 }
 0x24d   : > { %2068 = vmatpush3.bf16.xpose.msra.mxu1 %v1395_v45  ;;  %2069 = vmatprep.mubr.msk.bf16.mxu1 %vm2507_vm0, %v2506_v0 }
 0x24e   : > { %2079 = vmatprep.subr.bf16.mxu1 %v2506_v0 }
 0x254   : > { %2070 = vmatmul.mubr.msk.bf16.vlgmr.msra.gmra.mrb[28].mxu1 %vm727_vm2, %v1388_v47 }
 0x255   : > { %2080 = vmatpush3.bf16.xpose.msra.mxu1 %v1505_v48  ;;  %2081 = vmatprep.mubr.msk.bf16.mxu1 %vm2507_vm0, %v2506_v0 }
 0x256   : > { %2091 = vmatprep.subr.bf16.mxu1 %v2506_v0 }
 0x25c   : > { %2082 = vmatmul.mubr.msk.bf16.vlgmr.msra.gmra.mrb[32].mxu1 %vm727_vm2, %v1498_v49 }
 0x25d   : > { %2095 = vmatprep.mubr.msk.bf16.mxu1 %vm2507_vm0, %v2506_v0 }
 0x28d   : > { %v768_v50 = vpop.f32.mrb[4].mxu1 }
 0x28e   : > { %v1999_v51 = vpop.f32.mrb[5].mxu1  ;;  %v775_v52 = vsel %vm774_vm3, %v768_v50, -inf }
 0x28f   : > { %776 = vmax.xlane.f32.xlu0 %v775_v52  ;;  %v771_v53 = vpop.f32.mrb[6].mxu1 }
 0x290   : > { %v2000_v54 = vpop.f32.mrb[7].mxu1 }
 0x2ff   : > { %v880_v63 = vpop.f32.mrb[8].mxu1 }
 0x300   : > { %v2011_v1 = vpop.f32.mrb[9].mxu1  ;;  %v886_v2 = vsel %vm774_vm3, %v880_v63, -inf }
 0x301   : > { %887 = vmax.xlane.f32.xlu1 %v886_v2  ;;  %v883_v3 = vpop.f32.mrb[10].mxu1 }
 0x302   : > { %v2012_v4 = vpop.f32.mrb[11].mxu1 }
 0x307   : > { %v991_v5 = vpop.f32.mrb[12].mxu1 }
 0x308   : > { %v2023_v6 = vpop.f32.mrb[13].mxu1  ;;  %v997_v7 = vsel %vm774_vm3, %v991_v5, -inf }
 0x309   : > { %998 = vmax.xlane.f32.xlu0 %v997_v7  ;;  %v994_v8 = vpop.f32.mrb[14].mxu1 }
 0x30a   : > { %v2024_v9 = vpop.f32.mrb[15].mxu1 }
 0x30f   : > { %v1101_v10 = vpop.f32.mrb[16].mxu1 }
 0x310   : > { %v2035_v11 = vpop.f32.mrb[17].mxu1  ;;  %v1107_v12 = vsel %vm774_vm3, %v1101_v10, -inf }
 0x311   : > { %1108 = vmax.xlane.f32.xlu0 %v1107_v12  ;;  %v1104_v13 = vpop.f32.mrb[18].mxu1 }
 0x312   : > { %v2036_v14 = vpop.f32.mrb[19].mxu1 }
 0x317   : > { %v2970_v15 = vpop.f32.mrb[20].mxu1 }
 0x318   : > { %v2047_v16 = vpop.f32.mrb[21].mxu1  ;;  %v1217_v17 = vsel %vm774_vm3, %v2970_v15, -inf }
 0x319   : > { %1218 = vmax.xlane.f32.xlu1 %v1217_v17  ;;  %v1214_v18 = vpop.f32.mrb[22].mxu1 }
 0x31a   : > { %v2048_v19 = vpop.f32.mrb[23].mxu1 }
 0x31c   : > { %v777_v20 = vpop.xlane.xlu0 %776 }
 0x31d   : > { %v778_v21 = vsub.f32 %v768_v50, %v777_v20 }
 0x31f   : > { %v779_v22 = vmul.f32 1.442695, %v778_v21  ;;  %v2974_v23 = vpop.f32.mrb[24].mxu1 }
 0x320   : > { %v2059_v24 = vpop.f32.mrb[25].mxu1  ;;  %v1327_v25 = vsel %vm774_vm3, %v2974_v23, -inf }
 0x321   : > { %2212 = vpow2.f32 %v779_v22  ;;  %1328 = vmax.xlane.f32.xlu0 %v1327_v25  ;;  %v1324_v26 = vpop.f32.mrb[26].mxu1 }
 0x322   : > { %v2060_v27 = vpop.f32.mrb[27].mxu1 }
 0x327   : > { %v1431_v28 = vpop.f32.mrb[28].mxu1 }
 0x328   : > { %v2071_v29 = vpop.f32.mrb[29].mxu1  ;;  %v1437_v30 = vsel %vm774_vm3, %v1431_v28, -inf }
 0x329   : > { %1438 = vmax.xlane.f32.xlu1 %v1437_v30  ;;  %v1434_v31 = vpop.f32.mrb[30].mxu1 }
 0x32a   : > { %v2072_v32 = vpop.f32.mrb[31].mxu1 }
 0x32b   : > { %v2213_v33 = vpop.eup %2212 }
 0x32c   : > { %v781_v34 = vsel %vm774_vm3, %v2213_v33, 0.0 }
 0x32d   : > { %782 = vadd.xlane.f32.xlu1 %v781_v34 }
 0x32f   : > { %v1541_v35 = vpop.f32.mrb[32].mxu1 }
 0x330   : > { %v2083_v36 = vpop.f32.mrb[33].mxu1  ;;  %v1547_v37 = vsel %vm774_vm3, %v1541_v35, -inf }
 0x331   : > { %1548 = vmax.xlane.f32.xlu0 %v1547_v37  ;;  %v1544_v38 = vpop.f32.mrb[34].mxu1 }
 0x332   : > { %v2084_v39 = vpop.f32.mrb[35].mxu1 }
 0x33e   : > { %1009 = vrot.lane.b32.xlu1 %v2962_v60, %s2508_s10  ;;  %s2520_s10 = smov 24  }
 0x347   : > { %899 = vrot.lane.b32.xlu0 %v2962_v60, %s2509_s15  ;;  %s2521_s15 = smov 28  }
 0x38e   : > { %v888_v40 = vpop.xlane.xlu1 %887 }
 0x38f   : > { %v889_v41 = vsub.f32 %v880_v63, %v888_v40 }
 0x391   : > { %v890_v42 = vmul.f32 1.442695, %v889_v41 }
 0x393   : > { %2214 = vpow2.f32 %v890_v42 }
 0x396   : > { %v999_v43 = vpop.xlane.xlu0 %998 }
 0x397   : > { %v1000_v44 = vsub.f32 %v991_v5, %v999_v43 }
 0x399   : > { %v1001_v45 = vmul.f32 1.442695, %v1000_v44 }
 0x39b   : > { %2216 = vpow2.f32 %v1001_v45 }
 0x39d   : > { %v2985_v46 = vpop.eup %2214 }
 0x39e   : > { %v1109_v47 = vpop.xlane.xlu0 %1108  ;;  %v892_v48 = vsel %vm774_vm3, %v2985_v46, 0.0 }
 0x39f   : > { %v1110_v49 = vsub.f32 %v1101_v10, %v1109_v47  ;;  %893 = vadd.xlane.f32.xlu0 %v892_v48 }
 0x3a1   : > { %v1111_v50 = vmul.f32 1.442695, %v1110_v49 }
 0x3a3   : > { %2218 = vpow2.f32 %v1111_v50 }
 0x3a5   : > { %v2989_v51 = vpop.eup %2216 }
 0x3a6   : > { %v1003_v52 = vsel %vm774_vm3, %v2989_v51, 0.0  ;;  %v1219_v55 = vpop.xlane.xlu1 %1218 }
 0x3a7   : > { %1004 = vadd.xlane.f32.xlu1 %v1003_v52  ;;  %v1220_v62 = vsub.f32 %v2970_v15, %v1219_v55 }
 0x3a9   : > { %v1221_v4 = vmul.f32 1.442695, %v1220_v62 }
 0x3ad   : > { %v2993_v53 = vpop.eup %2218 }
 0x3ae   : > { %v1113_v54 = vsel %vm774_vm3, %v2993_v53, 0.0  ;;  %v1329_v58 = vpop.xlane.xlu0 %1328 }
 0x3af   : > { %1114 = vadd.xlane.f32.xlu0 %v1113_v54  ;;  %v1330_v5 = vsub.f32 %v2974_v23, %v1329_v58 }
 0x3b1   : > { %v1331_v7 = vmul.f32 1.442695, %v1330_v5 }
 0x3b6   : > { %v1439_v56 = vpop.xlane.xlu1 %1438 }
 0x3b7   : > { %v1440_v6 = vsub.f32 %v1431_v28, %v1439_v56 }
 0x3b8   : > { %1119 = vrot.lane.b32.xlu1 %v2962_v60, %s2510_s5 }
 0x3b9   : > { %v1441_v9 = vmul.f32 1.442695, %v1440_v6 }
 0x3ba   : > { %v783_v57 = vpop.xlane.xlu1 %782 }
 0x3bb   : > { %2220 = vrcp.f32 %v783_v57 }
 0x3bc   : > { %2222 = vpow2.f32 %v1221_v4 }
 0x3bd   : > { %2224 = vpow2.f32 %v1331_v7 }
 0x3be   : > { %v1549_v59 = vpop.xlane.xlu0 %1548  ;;  %2226 = vpow2.f32 %v1441_v9  ;;  %v1010_v20 = vpop.permute.xlu1 %1009 }
 0x3bf   : > { %v1550_v8 = vsub.f32 %v1541_v35, %v1549_v59  ;;  %v1015_v25 = vsel %vm790_vm4, %v1010_v20, 0 }
 0x3c1   : > { %v1551_v10 = vmul.f32 1.442695, %v1550_v8 }
 0x3c2   : > { %v900_v63 = vpop.permute.xlu0 %899 }
 0x3c3   : > { %v905_v3 = vsel %vm790_vm4, %v900_v63, 0  ;;  %2228 = vpow2.f32 %v1551_v10 }
 0x3c5   : > { %1229 = vrot.lane.b32.xlu0 %v2962_v60, %s2511_s20  ;;  %v2221_v61 = vpop.eup %2220 }
 0x3c6   : > { %v785_v1 = vmul.f32 %v2221_v61, %v2213_v33  ;;  %v2223_v11 = vpop.eup %2222 }
 0x3c7   : > { %v1223_v12 = vsel %vm774_vm3, %v2223_v11, 0.0  ;;  %v2225_v13 = vpop.eup %2224 }
 0x3c8   : > { %v786_v2 = vpack.c.bf16 %v785_v1, %v785_v1  ;;  %v3009_v14 = vpop.eup %2226  ;;  %v1333_v15 = vsel %vm774_vm3, %v2225_v13, 0.0 }
 0x3c9   : > { %v1443_v18 = vsel %vm774_vm3, %v3009_v14, 0.0 }
 0x3ca   : > { %2004 = vmatmul.mubr.msk.bf16.vlgmr.msra.gmra.mrb[8].mxu0 %vm774_vm3, %v786_v2 }
 0x3cb   : > { %2014 = vmatpush3.bf16.msra.mxu0 %v905_v3  ;;  %2015 = vmatprep.mubr.msk.bf16.mxu0 %vm2507_vm0, %v2506_v0 }
 0x3cc   : > { %2025 = vmatprep.subr.bf16.mxu0 %v2506_v0 }
 0x3cd   : > { %v3012_v16 = vpop.eup %2228 }
 0x3ce   : > { %v1553_v17 = vsel %vm774_vm3, %v3012_v16, 0.0 }
 0x3dc   : > { %1224 = vadd.xlane.f32.xlu1 %v1223_v12 }
 0x3e0   : > { %1334 = vadd.xlane.f32.xlu1 %v1333_v15 }
 0x3e4   : > { %1554 = vadd.xlane.f32.xlu1 %v1553_v17  ;;  %1444 = vadd.xlane.f32.xlu0 %v1443_v18 }
 0x3f5   : > { %1339 = vrot.lane.b32.xlu1 %v2962_v60, %s2512_s9  ;;  %s3193_s9 = sld [smem:[#allocation29_spill]] }
 0x3fa   : > { %1449 = vrot.lane.b32.xlu0 %v2962_v60, %s2513_s26  ;;  %s3194_s26 = sld [smem:[#allocation24_spill]] }
 0x3fe   : > { %1559 = vrot.lane.b32.xlu0 %v2962_v60, %s2514_s11  ;;  %s1924_s11 = sshll.u32 %s2604_s21, 7  ;;  %s1716_s21 = scalar_lea.sflag [#allocation4], %s2843_s16 }
 0x3ff   : > { %s3071_s13 = scalar_lea.hbm %s3195_s25, %s1924_s11 }
 0x400   : > { %p3196_p0 = scmp.ne.s32.totalorder %s3194_s26, 0 }
 0x402   : > { %p2420_p4 = pnand %p2419_p10, %p3196_p0 }
 0x404   : > { %p2421_p9 = pneg %p2420_p4 }
 0x42c   : > { %v894_v19 = vpop.xlane.xlu0 %893 }
 0x42d   : > { %2230 = vrcp.f32 %v894_v19 }
 0x434   : > { %v1005_v21 = vpop.xlane.xlu1 %1004 }
 0x435   : > { %2232 = vrcp.f32 %v1005_v21  ;;  %v2211_v21 = vld [vmem:[#allocation11 + $0x8] sm:$0xff]  }
 0x437   : > { %v2231_v22 = vpop.eup %2230 }
 0x438   : > { %v896_v23 = vmul.f32 %v2231_v22, %v2985_v46  ;;  %v1120_v28 = vpop.permute.xlu1 %1119 }
 0x439   : > { %v1125_v30 = vsel %vm790_vm4, %v1120_v28, 0 }
 0x43a   : > { %v897_v24 = vpack.c.bf16 %v896_v23, %v896_v23 }
 0x43c   : > { %v1115_v26 = vpop.xlane.xlu0 %1114  ;;  %2016 = vmatmul.mubr.msk.bf16.vlgmr.msra.gmra.mrb[12].mxu0 %vm774_vm3, %v897_v24 }
 0x43d   : > { %2234 = vrcp.f32 %v1115_v26  ;;  %2026 = vmatpush3.bf16.msra.mxu0 %v1015_v25  ;;  %2027 = vmatprep.mubr.msk.bf16.mxu0 %vm2507_vm0, %v2506_v0 }
 0x43e   : > { %2037 = vmatprep.subr.bf16.mxu0 %v2506_v0 }
 0x43f   : > { %v2233_v60 = vpop.eup %2232 }
 0x440   : > { %v1007_v27 = vmul.f32 %v2233_v60, %v2989_v51  ;;  %v1230_v33 = vpop.permute.xlu0 %1229 }
 0x441   : > { %v1235_v35 = vsel %vm790_vm4, %v1230_v33, 0 }
 0x442   : > { %v1008_v29 = vpack.c.bf16 %v1007_v27, %v1007_v27 }
 0x444   : > { %2028 = vmatmul.mubr.msk.bf16.vlgmr.msra.gmra.mrb[16].mxu0 %vm774_vm3, %v1008_v29 }
 0x445   : > { %2038 = vmatpush3.bf16.msra.mxu0 %v1125_v30  ;;  %2039 = vmatprep.mubr.msk.bf16.mxu0 %vm2507_vm0, %v2506_v0 }
 0x446   : > { %2049 = vmatprep.subr.bf16.mxu0 %v2506_v0 }
 0x447   : > { %v2235_v31 = vpop.eup %2234 }
 0x448   : > { %v1117_v32 = vmul.f32 %v2235_v31, %v2993_v53 }
 0x44a   : > { %v1118_v34 = vpack.c.bf16 %v1117_v32, %v1117_v32 }
 0x44c   : > { %2040 = vmatmul.mubr.msk.bf16.vlgmr.msra.gmra.mrb[20].mxu0 %vm774_vm3, %v1118_v34 }
 0x44d   : > { %2050 = vmatpush3.bf16.msra.mxu0 %v1235_v35  ;;  %2051 = vmatprep.mubr.msk.bf16.mxu0 %vm2507_vm0, %v2506_v0 }
 0x44e   : > { %2061 = vmatprep.subr.bf16.mxu0 %v2506_v0 }
 0x469   : > { %v1225_v36 = vpop.xlane.xlu1 %1224 }
 0x46a   : > { %2236 = vrcp.f32 %v1225_v36 }
 0x46d   : > { %v1335_v37 = vpop.xlane.xlu1 %1334 }
 0x46e   : > { %2238 = vrcp.f32 %v1335_v37 }
 0x471   : > { %v1555_v38 = vpop.xlane.xlu1 %1554  ;;  %v1445_v39 = vpop.xlane.xlu0 %1444 }
 0x472   : > { %2240 = vrcp.f32 %v1445_v39 }
 0x473   : > { %2242 = vrcp.f32 %v1555_v38 }
 0x474   : > { %v2237_v40 = vpop.eup %2236 }
 0x475   : > { %v1227_v41 = vmul.f32 %v2237_v40, %v2223_v11  ;;  %v1340_v42 = vpop.permute.xlu1 %1339  ;;  %v1450_v47 = vpop.permute.xlu0 %1449 }
 0x476   : > { %v1345_v45 = vsel %vm790_vm4, %v1340_v42, 0  ;;  %v1455_v50 = vsel %vm790_vm4, %v1450_v47, 0 }
 0x477   : > { %v1228_v43 = vpack.c.bf16 %v1227_v41, %v1227_v41 }
 0x478   : > { %v2239_v44 = vpop.eup %2238 }
 0x479   : > { %2052 = vmatmul.mubr.msk.bf16.vlgmr.msra.gmra.mrb[24].mxu0 %vm774_vm3, %v1228_v43  ;;  %v1337_v46 = vmul.f32 %v2239_v44, %v2225_v13  ;;  %v1560_v52 = vpop.permute.xlu0 %1559  ;;  %v1919_v43 = vld [vmem:[%s3193_s9] ss:$0 sm:$0xff] }
 0x47a   : > { %2062 = vmatpush3.bf16.msra.mxu0 %v1345_v45  ;;  %2063 = vmatprep.mubr.msk.bf16.mxu0 %vm2507_vm0, %v2506_v0  ;;  %v1565_v55 = vsel %vm790_vm4, %v1560_v52, 0 }
 0x47b   : > { %2073 = vmatprep.subr.bf16.mxu0 %v2506_v0  ;;  %v1338_v48 = vpack.c.bf16 %v1337_v46, %v1337_v46 }
 0x47c   : > { %v2241_v49 = vpop.eup %2240 }
 0x47d   : > { %v1447_v51 = vmul.f32 %v2241_v49, %v3009_v14  ;;  %v2243_v54 = vpop.eup %2242 }
 0x47e   : > { %v1557_v56 = vmul.f32 %v2243_v54, %v3012_v16  ;;  %v2210_v16 = vld [vmem:[#allocation11] sm:$0xff]  }
 0x47f   : > { %v1448_v53 = vpack.c.bf16 %v1447_v51, %v1447_v51  ;;  %2092 = vmatpush3.bf16.msra.mxu1 %v2210_v16 }
 0x480   : > { %v1558_v57 = vpack.c.bf16 %v1557_v56, %v1557_v56  ;;  %2093 = vmatprep.subr.bf16.mxu1 %v2506_v0 }
 0x481   : > { %2064 = vmatmul.mubr.msk.bf16.vlgmr.msra.gmra.mrb[28].mxu0 %vm774_vm3, %v1338_v48 }
 0x482   : > { %2074 = vmatpush3.bf16.msra.mxu0 %v1455_v50  ;;  %2075 = vmatprep.mubr.msk.bf16.mxu0 %vm2507_vm0, %v2506_v0 }
 0x483   : > { %2085 = vmatprep.subr.bf16.mxu0 %v2506_v0  ;;  %2094 = vmatpush3.bf16.msra.mxu1 %v2211_v21 }
 0x489   : > { %2076 = vmatmul.mubr.msk.bf16.vlgmr.msra.gmra.mrb[32].mxu0 %vm774_vm3, %v1448_v53 }
 0x48a   : > { %2086 = vmatpush3.bf16.msra.mxu0 %v1565_v55  ;;  %2087 = vmatprep.mubr.msk.bf16.mxu0 %vm2507_vm0, %v2506_v0 }
 0x491   : > { %2088 = vmatmul.mubr.msk.bf16.vlgmr.msra.gmra.mrb[36].mxu0 %vm774_vm3, %v1558_v57 }
 0x49d   : > { %v828_v58 = vpop.f32.mrb[8].mxu0 }
 0x49e   : > { %v2005_v59 = vpop.f32.mrb[9].mxu0 }
 0x49f   : > { %v831_v61 = vpop.f32.mrb[10].mxu0 }
 0x4a0   : > { %v2006_v62 = vpop.f32.mrb[11].mxu0 }
 0x50f   : > { %v941_v63 = vpop.f32.mrb[12].mxu0 }
 0x510   : > { %1608 = vrot.lane.b32.xlu1 %v941_v63, %s2515_s22  ;;  %v2017_v1 = vpop.f32.mrb[13].mxu0  ;;  %s2422_s22 = sshll.u32 %s2522_s27, 4  ;;  %s2423_s22 = int_to_ptr.vmem [resolvable:$false] %s2422_s22 }
 0x511   : > { %v944_v2 = vpop.f32.mrb[14].mxu0  ;;  %p2425_p13 = scmp.lt.s32.totalorder %s3073_s12, %s2423_s22 }
 0x512   : > { %v2018_v3 = vpop.f32.mrb[15].mxu0 }
 0x517   : > { %v1051_v4 = vpop.f32.mrb[16].mxu0 }
 0x518   : > { %1612 = vrot.lane.b32.xlu0 %v1051_v4, %s2516_s23  ;;  %v2029_v5 = vpop.f32.mrb[17].mxu0  ;;  %s2424_s23 = scalar_lea.vmem %s2423_s22, 256 }
 0x519   : > { %v1054_v6 = vpop.f32.mrb[18].mxu0  ;;  %p2426_p7 = scmp.lt.s32.totalorder %s2424_s23, %s2418_s29 }
 0x51a   : > { %v2030_v7 = vpop.f32.mrb[19].mxu0 }
 0x51b   : > { %p2427_p3 = por %p2426_p7, %p2425_p13 }
 0x51d   : > { %p2428_p5 = pnand %p2427_p3, %p2421_p9 }
 0x51f   : > { %v1161_v8 = vpop.f32.mrb[20].mxu0 }
 0x520   : > { %1616 = vrot.lane.b32.xlu1 %v1161_v8, %s2517_s24  ;;  %v2041_v9 = vpop.f32.mrb[21].mxu0 }
 0x521   : > { %v1164_v10 = vpop.f32.mrb[22].mxu0 }
 0x522   : > { %v2042_v11 = vpop.f32.mrb[23].mxu0 }
 0x54c   : > { %v1271_v12 = vpop.f32.mrb[24].mxu0 }
 0x54d   : > { %1620 = vrot.lane.b32.xlu0 %v1271_v12, %s2518_s30  ;;  %v2053_v13 = vpop.f32.mrb[25].mxu0 }
 0x54e   : > { %v1274_v14 = vpop.f32.mrb[26].mxu0 }
 0x54f   : > { %v2054_v15 = vpop.f32.mrb[27].mxu0 }
 0x554   : > { %v1381_v17 = vpop.f32.mrb[28].mxu0 }
 0x555   : > { %1624 = vrot.lane.b32.xlu1 %v1381_v17, %s2519_s17  ;;  %v2065_v18 = vpop.f32.mrb[29].mxu0 }
 0x556   : > { %v1384_v19 = vpop.f32.mrb[30].mxu0 }
 0x557   : > { %v2066_v20 = vpop.f32.mrb[31].mxu0 }
 0x55c   : > { %v1491_v22 = vpop.f32.mrb[32].mxu0 }
 0x55d   : > { %1628 = vrot.lane.b32.xlu0 %v1491_v22, %s2520_s10  ;;  %v2077_v23 = vpop.f32.mrb[33].mxu0 }
 0x55e   : > { %v1494_v24 = vpop.f32.mrb[34].mxu0 }
 0x55f   : > { %v2078_v25 = vpop.f32.mrb[35].mxu0 }
 0x564   : > { %v1601_v26 = vpop.f32.mrb[36].mxu0 }
 0x565   : > { %1632 = vrot.lane.b32.xlu1 %v1601_v26, %s2521_s15  ;;  %v2089_v60 = vpop.f32.mrb[37].mxu0 }
 0x566   : > { %v1604_v27 = vpop.f32.mrb[38].mxu0 }
 0x567   : > { %v2090_v0 = vpop.f32.mrb[39].mxu0 }
 0x582   : > { %v1609_v28 = vpop.permute.xlu1 %1608 }
 0x583   : > { %v1635_v32 = vsel %vm727_vm2, %v828_v58, %v1609_v28 }
 0x58a   : > { %v1613_v29 = vpop.permute.xlu0 %1612 }
 0x58b   : > { %v1636_v33 = vsel %vm774_vm3, %v1635_v32, %v1613_v29 }
 0x592   : > { %v1617_v30 = vpop.permute.xlu1 %1616 }
 0x593   : > { %v1638_v35 = vsel %vm1637_vm5, %v1636_v33, %v1617_v30 }
 0x5bf   : > { %v1621_v31 = vpop.permute.xlu0 %1620 }
 0x5c0   : > { %v1640_v37 = vsel %vm1639_vm6, %v1638_v35, %v1621_v31 }
 0x5c7   : > { %v1625_v34 = vpop.permute.xlu1 %1624 }
 0x5c8   : > { %v1642_v38 = vsel %vm1641_vm7, %v1640_v37, %v1625_v34 }
 0x5cf   : > { %v1629_v36 = vpop.permute.xlu0 %1628 }
 0x5d0   : > { %v1644_v39 = vsel %vm1643_vm8, %v1642_v38, %v1629_v36 }
 0x5d7   : > { %v1633_v40 = vpop.permute.xlu1 %1632 }
 0x5d8   : > { %v1646_v41 = vsel %vm1645_vm9, %v1644_v39, %v1633_v40 }
 0x5d9   : > { %v1647_v42 = vpack.c.bf16 %v1646_v41, %v1646_v41 }
 0x5db   : > { %2096 = vmatmul.mubr.msk.bf16.vlgmr.msra.gmra.mrb[36].mxu1 %vm543_vm1, %v1647_v42 }
 0x6ae   : > { %v1708_v44 = vpop.f32.mrb[36].mxu1 }
 0x6af   : > { %v1709_v45 = vadd.f32 %v1919_v43, %v1708_v44  ;;  %v2097_v46 = vpop.f32.mrb[37].mxu1 }
 0x6b0   : > { %v1711_v47 = vpop.f32.mrb[38].mxu1 }
 0x6b1   : > { %v2098_v48 = vpop.f32.mrb[39].mxu1  ;;  %1714 = vst.msk [vmem:[%s516_s14] sm:$0xff] %vm543_vm1, %v1709_v45 }
 0x6b2   : > { %2431 = shalt.err (!%p2428_p5)
}
 0x6b3   : > { %s2432_s16 = scalar_lea.hbm %s3071_s13, 128  ;;  %s2436_s17 = scalar_lea.hbm %s3195_s25, 256 }
 0x6b4   : > { %p2433_p2 = scmp.ne.s32.totalorder %s3071_s13, %s2432_s16  ;;  %p2437_p12 = scmp.lt.u32.totalorder %s3071_s13, %s3195_s25 }
 0x6b5   : > { %p2438_p1 = scmp.lt.u32.totalorder %s2436_s17, %s2432_s16  ;;  %p2440_p10 = scmp.lt.u32.totalorder %s2432_s16, %s3071_s13 }
 0x6b6   : > { %p2434_p8 = pnand %p2433_p2, %p3196_p0 }
 0x6b7   : > { %p2439_p6 = por %p2438_p1, %p2437_p12 }
 0x6b8   : > { %p2435_p11 = pneg %p2434_p8 }
 0x6b9   : > { %p2441_p4 = por %p2440_p10, %p2439_p6 }
 0x6bb   : > { %p2442_p9 = pnand %p2441_p4, %p2435_p11 }
 0x6bd   : > { %2445 = shalt.err (!%p2442_p9)
}
 0x6be   : > { %2117 = dma.vmem_to_hbm [thread:$0]  (%p3196_p0), %s3073_s12, 128, %s3071_s13, %s1716_s21  }
 0x6bf PF: > { %s3197_s5 = sld [smem:[#allocation19_spill]]  ;;  %s3198_s20 = sld [smem:[#allocation21_spill]] }
 0x6c0   : > { %s3199_s9 = sld [smem:[#allocation20_spill]] }
 0x6c5   : > { %s1741_s11 = sand.u32 1, %s3197_s5   ;;  %p3200_p13 = scmp.ne.s32.totalorder %s3198_s20, 0 }
 0x6c6   : > { %p3201_p7 = scmp.ge.s32.totalorder %s3199_s9, 2  ;;  %s1742_s14 = scalar_lea.sflag [#allocation4], %s1741_s11 }
 0x6c8   : > { %p2140_p3 = pnand %p3201_p7, %p3200_p13 }
 0x6ca   : > { %2479 = dma.done.wait (!%p2140_p3), %s1742_s14, 128  }
 0x6cb   : > { %2481 = vsyncadd (!%p2140_p3), %s1742_s14, 4294967168  ;;  %s3202_s20 = sld [smem:[#allocation22_spill]]  ;;  %s3203_s3 = sld [smem:[#allocation23_spill]] }
 0x6cc   : > { %s3204_s17 = smov %s2488_s18  ;;  %s3205_s18 = smov %s2492_s19 }
 0x6d1   : > { %p29_p5 = scmp.ge.s32.totalorder %s3202_s20, 4   ;;  %s3206_s19 = smov %s3203_s3 }
 0x6d3   :  { %31 = sbr.rel (!%p29_p5) target bundleno = 16 (0x10), region = 145 }
 0x6da   :  { %1747 = vsyncpa [#allocation3], 1 }
 0x6db   :  { %1749 = vsyncpa [#allocation3 + $0x1], 1 }
 0x6dc   :  { %1750 = vsyncpa [#allocation6], 1 }
 0x6dd   :  { %1752 = vsyncpa [#allocation6 + $0x1], 1 }
 0x6de   :  { %1753 = vsyncpa [#allocation9], 1 }
 0x6df   :  { %1754 = vsyncpa [#allocation12], 1 }
 0x6e0   :  { %1755 = vsyncpa [#allocation4], 1 }
 0x6e1   :  { %1757 = vsyncpa [#allocation4 + $0x1], 1 }

</bundles_post_ra>
